<compile_context>
chip_gen: v7x
topology: tpu7x:2x2x1
jax: 0.10.0
libtpu: 0.0.40
codegen_flags: <defaults>
</compile_context>

<pallas_src>
import jax
import jax.numpy as jnp
import numpy as np
from jax import lax
from jax.experimental import pallas as pl
from jax.experimental.pallas import tpu as pltpu


# ----------------------------------------------------------------------------- helpers
def _round_up(x, m):
    return (x + m - 1) // m * m


def _vmem_budget_and_cap():
    """Per-generation VMEM capacity (v5e/v6e: 128 MiB, v7x: 64 MiB) -> sizing budget."""
    try:
        cap = int(pltpu.get_tpu_info().vmem_capacity_bytes)
    except Exception:
        cap = 64 * 1024 * 1024            # conservative: v7x per-TensorCore size
    budget = min(int(cap * 0.45), 48 * 1024 * 1024)   # leave headroom (review: cap ~48 MiB)
    return max(budget, 8 * 1024 * 1024), cap


def _pick_rows_per_band(wp, rows_needed, f_out, budget_bytes):
    """Rows per streamed band: multiple of 8 (sublane tile), bounded by the f32 feats+acc
    intermediates and the double-buffered bf16 x block, capped to keep the unrolled row-copy
    loop small."""
    per_row_bytes = 2 * f_out * wp * 4 + 2 * 2 * 8 * _round_up(wp, 128)
    cap_rows = max(8, (budget_bytes // max(per_row_bytes, 1)) // 8 * 8)
    need_rows = _round_up(max(rows_needed, 1), 8)
    return int(max(8, min(64, cap_rows, need_rows)))


# ----------------------------------------------------------------------------- kernel
def _make_kernel(*, n_ch, f_out, h_img, wp, rpb, blk, hal, inv_hw):
    taps = [(ky, kx) for ky in range(3) for kx in range(3)]

    def kernel(x_ref, colmask_ref, wt_ref, bc_ref, wl_ref, bl_ref, out_ref,
               win_ref, acc_ref):
        # x_ref:       (C, rpb, Wp)   bf16  streamed row band of the padded image
        # colmask_ref: (1, blk)       f32   column-validity pattern (resident)
        # wt_ref:      (9, F, C)      bf16  conv weight per tap (ky*3+kx)
        # bc_ref:      (F, 1)         f32   conv bias
        # wl_ref:      (NC, F)        f32   classifier weight
        # bl_ref:      (NC, 1)        f32   classifier bias
        # out_ref:     (NC, 1)        f32   per-image logits (written on last band only)
        # win_ref:     (C, blk+hal)   bf16  flat stencil window (carried halo at the front)
        # acc_ref:     (F, blk)       f32   per-lane pooled-sum accumulator
        band = pl.program_id(1)

        # ---- init (first band of every image) --------------------------------------
        @pl.when(band == 0)
        def _init():
            win_ref[:, :hal] = jnp.zeros((n_ch, hal), win_ref.dtype)
            acc_ref[...] = jnp.zeros_like(acc_ref)

        # ---- carry the stencil halo (last hal positions of the previous band) ------
        @pl.when(band > 0)
        def _carry():
            win_ref[:, :hal] = win_ref[:, blk:blk + hal]

        # ---- un-tile the streamed row band into the flat stencil window ------------
        for r in range(rpb):                                   # static, small (<= 64)
            win_ref[:, hal + r * wp: hal + (r + 1) * wp] = x_ref[:, r, :]

        # ---- fused im2col + conv: 9 static-offset tap matmuls (MXU, f32 acc) --------
        acc9 = None
        for t, (ky, kx) in enumerate(taps):
            off = ky * wp + kx
            xs = win_ref[:, off:off + blk]                     # (C, blk) bf16, static slice
            part = jnp.dot(wt_ref[t], xs, preferred_element_type=jnp.float32)
            acc9 = part if acc9 is None else acc9 + part
        feats = jnp.maximum(acc9 + bc_ref[...], 0.0)           # (F, blk) f32, bias + ReLU

        # ---- validity mask + single wide accumulator update -------------------------
        lane = lax.broadcasted_iota(jnp.int32, (1, blk), 1)
        lo = hal - band * blk                                  # anchor flat index >= 0
        hi = h_img * wp + hal - band * blk                     # anchor flat index < H*Wp
        in_range = jnp.logical_and(lane >= lo, lane < hi)
        mask = jnp.where(in_range, colmask_ref[...], 0.0)      # (1, blk) f32
        acc_ref[...] += feats * mask                           # one wide VPU += per step

        # ---- finalize: global average pool + linear head (last band only) -----------
        @pl.when(band == pl.num_programs(1) - 1)
        def _finalize():
            pooled = jnp.sum(acc_ref[...], axis=1, keepdims=True) * inv_hw   # (F, 1)
            logits = jnp.dot(wl_ref[...], pooled,
                             preferred_element_type=jnp.float32) + bl_ref[...]
            out_ref[...] = logits

    return kernel


# ----------------------------------------------------------------------------- wrapper
def cls_model_forward(x, conv_w, conv_b, head_w, head_b, *, rows_per_band=None):
    """x: [B, C, H, W] (NCHW, like PyTorch). Returns (logits [B, NC], logits_aux [B])."""
    B, C, H, W = x.shape
    F_out, C_w, kh, kw = conv_w.shape
    assert (kh, kw) == (3, 3) and C_w == C
    NC = head_w.shape[0]

    Wp = W + 2                              # SAME halo: 1 col left + 1 col right
    hal = 2 * Wp + 2                        # flat stencil footprint of a 3x3 tap window
    flat_needed = H * Wp + hal              # last anchor's bottom-right tap position + 1

    budget, cap = _vmem_budget_and_cap()
    rows_needed = -(-flat_needed // Wp)
    if rows_per_band is None:
        rpb = _pick_rows_per_band(Wp, rows_needed, F_out, budget)
    else:
        rpb = max(8, _round_up(int(rows_per_band), 8))
    blk = rpb * Wp                          # anchors per band (multiple of Wp by construction)
    nbands = -(-flat_needed // blk)
    Htot = nbands * rpb                     # total padded rows streamed (> H + 2)

    # --- wrapper-side layout prep: one cheap pad + bf16 cast pass (no im2col in HBM) ----
    xp = jnp.pad(x, ((0, 0), (0, 0), (1, Htot - H - 1), (1, 1))).astype(jnp.bfloat16)

    wt = jnp.transpose(conv_w, (2, 3, 0, 1)).reshape(9, F_out, C).astype(jnp.bfloat16)
    bc = conv_b.reshape(F_out, 1).astype(jnp.float32)
    wl = head_w.astype(jnp.float32)
    bl = head_b.reshape(NC, 1).astype(jnp.float32)

    # column-validity pattern is band-independent because blk % Wp == 0 (compile-time constant)
    colmask = (((np.arange(blk) - 2) % Wp) < W).astype(np.float32).reshape(1, blk)
    colmask = jnp.asarray(colmask)

    grid_spec = pltpu.PrefetchScalarGridSpec(
        num_scalar_prefetch=0,
        grid=(B, nbands),                                            # batch x row-bands
        in_specs=[
            pl.BlockSpec((None, C, rpb, Wp), lambda b, i: (b, 0, i, 0)),   # streamed x rows
            pl.BlockSpec((1, blk), lambda b, i: (0, 0)),                   # col mask (resident)
            pl.BlockSpec((9, F_out, C), lambda b, i: (0, 0, 0)),           # conv taps (resident)
            pl.BlockSpec((F_out, 1), lambda b, i: (0, 0)),                 # conv bias
            pl.BlockSpec((NC, F_out), lambda b, i: (0, 0)),                # head weight
            pl.BlockSpec((NC, 1), lambda b, i: (0, 0)),                    # head bias
        ],
        out_specs=pl.BlockSpec((None, NC, 1), lambda b, i: (b, 0, 0)),     # per-image logits
        scratch_shapes=[
            pltpu.VMEM((C, blk + hal), jnp.bfloat16),                      # stencil window
            pltpu.VMEM((F_out, blk), jnp.float32),                         # pooled-sum acc
        ],
    )

    # honest VMEM estimate: double-buffered x block + window + f32 acc scratch + live f32 feats
    vmem_est = (2 * C * rpb * _round_up(Wp, 128) * 2
                + 8 * _round_up(blk + hal, 128) * 2
                + 2 * F_out * _round_up(blk, 128) * 4
                + (2 << 20))
    vmem_limit = int(min(int(0.75 * cap), max(32 << 20, 2 * vmem_est)))

    kernel = _make_kernel(n_ch=C, f_out=F_out, h_img=H, wp=Wp, rpb=rpb, blk=blk,
                          hal=hal, inv_hw=1.0 / float(H * W))

    out = pl.pallas_call(
        kernel,
        out_shape=jax.ShapeDtypeStruct((B, NC, 1), jnp.float32),
        grid_spec=grid_spec,
        compiler_params=pltpu.CompilerParams(
            dimension_semantics=("parallel", "arbitrary"),   # batch parallel, bands sequential
            vmem_limit_bytes=vmem_limit),
    )(xp, colmask, wt, bc, wl, bl)

    logits = out[:, :, 0]                                    # (B, NC)
    # num_classes_aux == 0  ->  logits_aux = torch.zeros(batch_size)
    logits_aux = jnp.zeros((B,), dtype=jnp.float32)
    return logits, logits_aux


# ----------------------------------------------------------------------------- reference / test
def _reference(x, conv_w, conv_b, head_w, head_b):
    # plain-JAX reference; inputs rounded to bf16 to mirror the kernel's MXU operand precision
    xb = x.astype(jnp.bfloat16).astype(jnp.float32)
    wb = conv_w.astype(jnp.bfloat16).astype(jnp.float32)
    feats = lax.conv_general_dilated(xb, wb, (1, 1), "SAME")            # (B, F, H, W)
    feats = jnp.maximum(feats + conv_b[None, :, None, None], 0.0)
    pooled = feats.mean((-1, -2))                                       # (B, F)
    return pooled @ head_w.T + head_b


if __name__ == "__main__":
    key = jax.random.PRNGKey(0)
    k_x, k_cw, k_cb, k_hw, k_hb, k_x2 = jax.random.split(key, 6)

    B, C, H, W = 2, 3, 16, 16        # batch x n_channels x H x W
    F_out = 32                       # encoder.num_features
    NC = 2                           # num_classes (default)

    x = jax.random.normal(k_x, (B, C, H, W), dtype=jnp.float32)
    conv_w = jax.random.normal(k_cw, (F_out, C, 3, 3), dtype=jnp.float32) * 0.1
    conv_b = jax.random.normal(k_cb, (F_out,), dtype=jnp.float32) * 0.1
    head_w = jax.random.normal(k_hw, (NC, F_out), dtype=jnp.float32) * 0.1
    head_b = jax.random.normal(k_hb, (NC,), dtype=jnp.float32) * 0.1

    fwd = jax.jit(cls_model_forward, static_argnames=("rows_per_band",))

    # single-band path (auto-sized band)
    logits, logits_aux = fwd(x, conv_w, conv_b, head_w, head_b)
    jax.block_until_ready((logits, logits_aux))
    ref = _reference(x, conv_w, conv_b, head_w, head_b)
    assert logits.shape == (B, NC) and logits_aux.shape == (B,)
    assert jnp.allclose(logits, ref, atol=2e-3, rtol=2e-3)

    # multi-band streaming path (forces >1 band -> exercises the carried stencil halo)
    H2 = W2 = 24
    x2 = jax.random.normal(k_x2, (B, C, H2, W2), dtype=jnp.float32)
    logits2, _ = fwd(x2, conv_w, conv_b, head_w, head_b, rows_per_band=8)
    jax.block_until_ready(logits2)
    ref2 = _reference(x2, conv_w, conv_b, head_w, head_b)
    assert jnp.allclose(logits2, ref2, atol=2e-3, rtol=2e-3)

    print("KERNEL_OK")
</pallas_src>

<mosaic_0001>
module attributes {stable_mosaic.version = 11 : i64} {
  func.func @kernel(%arg0: i32, %arg1: i32, %arg2: memref<1x3x24x18xbf16, #tpu.memory_space<vmem>>, %arg3: memref<1x432xf32, #tpu.memory_space<vmem>>, %arg4: memref<9x32x3xbf16, #tpu.memory_space<vmem>>, %arg5: memref<32x1xf32, #tpu.memory_space<vmem>>, %arg6: memref<2x32xf32, #tpu.memory_space<vmem>>, %arg7: memref<2x1xf32, #tpu.memory_space<vmem>>, %arg8: memref<1x2x1xf32, #tpu.memory_space<vmem>>, %arg9: memref<3x470xbf16, #tpu.memory_space<vmem>>, %arg10: memref<32x432xf32, #tpu.memory_space<vmem>>) attributes {dimension_semantics = [#tpu.dimension_semantics<parallel>, #tpu.dimension_semantics<arbitrary>], iteration_bounds = array<i64: 2, 1>, scalar_prefetch = 0 : i64, scratch_operands = 2 : i64, tpu.core_type = #tpu.core_type<tc>, window_params = [{transform_indices = @transform_0, window_bounds = array<i64: 1, 3, 24, 18>}, {pipeline_mode = #tpu.pipeline_mode<synchronous>, transform_indices = @transform_1, window_bounds = array<i64: 1, 432>}, {pipeline_mode = #tpu.pipeline_mode<synchronous>, transform_indices = @transform_2, window_bounds = array<i64: 9, 32, 3>}, {pipeline_mode = #tpu.pipeline_mode<synchronous>, transform_indices = @transform_3, window_bounds = array<i64: 32, 1>}, {pipeline_mode = #tpu.pipeline_mode<synchronous>, transform_indices = @transform_4, window_bounds = array<i64: 2, 32>}, {pipeline_mode = #tpu.pipeline_mode<synchronous>, transform_indices = @transform_5, window_bounds = array<i64: 2, 1>}, {transform_indices = @transform_6, window_bounds = array<i64: 1, 2, 1>}]} {
    %c0_i32 = arith.constant 0 : i32
    %0 = arith.cmpi eq, %arg1, %c0_i32 : i32
    %1 = arith.extui %0 : i1 to i32
    %c0_i32_0 = arith.constant 0 : i32
    %2 = arith.cmpi ne, %1, %c0_i32_0 : i32
    scf.if %2 {
      %cst_163 = arith.constant 0.000000e+00 : bf16
      %148 = vector.broadcast %cst_163 : bf16 to vector<3x38xbf16>
      %c0_164 = arith.constant 0 : index
      %c0_165 = arith.constant 0 : index
      %149 = vector.load %arg9[%c0_164, %c0_165] : memref<3x470xbf16, #tpu.memory_space<vmem>>, vector<3x38xbf16>
      tpu.vector_store %arg9[%c0_164, %c0_165], %148 {strides = array<i32>} : memref<3x470xbf16, #tpu.memory_space<vmem>>, vector<3x38xbf16>,
      %cst_166 = arith.constant 0.000000e+00 : f32
      %150 = vector.broadcast %cst_166 : f32 to vector<32x432xf32>
      %c0_167 = arith.constant 0 : index
      %c0_168 = arith.constant 0 : index
      %151 = vector.load %arg10[%c0_167, %c0_168] : memref<32x432xf32, #tpu.memory_space<vmem>>, vector<32x432xf32>
      tpu.vector_store %arg10[%c0_167, %c0_168], %150 {strides = array<i32>} : memref<32x432xf32, #tpu.memory_space<vmem>>, vector<32x432xf32>,
    } else {
    }
    %c0_i32_1 = arith.constant 0 : i32
    %3 = arith.cmpi sgt, %arg1, %c0_i32_1 : i32
    %4 = arith.extui %3 : i1 to i32
    %c0_i32_2 = arith.constant 0 : i32
    %5 = arith.cmpi ne, %4, %c0_i32_2 : i32
    scf.if %5 {
      %c0_163 = arith.constant 0 : index
      %c432 = arith.constant 432 : index
      %148 = vector.load %arg9[%c0_163, %c432] : memref<3x470xbf16, #tpu.memory_space<vmem>>, vector<3x38xbf16>
      %c0_164 = arith.constant 0 : index
      %c0_165 = arith.constant 0 : index
      %149 = vector.load %arg9[%c0_164, %c0_165] : memref<3x470xbf16, #tpu.memory_space<vmem>>, vector<3x38xbf16>
      tpu.vector_store %arg9[%c0_164, %c0_165], %148 {strides = array<i32>} : memref<3x470xbf16, #tpu.memory_space<vmem>>, vector<3x38xbf16>,
    } else {
    }
    %c0 = arith.constant 0 : index
    %c0_3 = arith.constant 0 : index
    %c0_4 = arith.constant 0 : index
    %c0_5 = arith.constant 0 : index
    %6 = vector.load %arg2[%c0, %c0_3, %c0_4, %c0_5] : memref<1x3x24x18xbf16, #tpu.memory_space<vmem>>, vector<1x3x1x18xbf16>
    %7 = vector.shape_cast %6 : vector<1x3x1x18xbf16> to vector<3x18xbf16>
    %c0_6 = arith.constant 0 : index
    %c38 = arith.constant 38 : index
    %8 = vector.load %arg9[%c0_6, %c38] : memref<3x470xbf16, #tpu.memory_space<vmem>>, vector<3x18xbf16>
    tpu.vector_store %arg9[%c0_6, %c38], %7 {strides = array<i32>} : memref<3x470xbf16, #tpu.memory_space<vmem>>, vector<3x18xbf16>,
    %c0_7 = arith.constant 0 : index
    %c0_8 = arith.constant 0 : index
    %c1 = arith.constant 1 : index
    %c0_9 = arith.constant 0 : index
    %9 = vector.load %arg2[%c0_7, %c0_8, %c1, %c0_9] : memref<1x3x24x18xbf16, #tpu.memory_space<vmem>>, vector<1x3x1x18xbf16>
    %10 = vector.shape_cast %9 : vector<1x3x1x18xbf16> to vector<3x18xbf16>
    %c0_10 = arith.constant 0 : index
    %c56 = arith.constant 56 : index
    %11 = vector.load %arg9[%c0_10, %c56] : memref<3x470xbf16, #tpu.memory_space<vmem>>, vector<3x18xbf16>
    tpu.vector_store %arg9[%c0_10, %c56], %10 {strides = array<i32>} : memref<3x470xbf16, #tpu.memory_space<vmem>>, vector<3x18xbf16>,
    %c0_11 = arith.constant 0 : index
    %c0_12 = arith.constant 0 : index
    %c2 = arith.constant 2 : index
    %c0_13 = arith.constant 0 : index
    %12 = vector.load %arg2[%c0_11, %c0_12, %c2, %c0_13] : memref<1x3x24x18xbf16, #tpu.memory_space<vmem>>, vector<1x3x1x18xbf16>
    %13 = vector.shape_cast %12 : vector<1x3x1x18xbf16> to vector<3x18xbf16>
    %c0_14 = arith.constant 0 : index
    %c74 = arith.constant 74 : index
    %14 = vector.load %arg9[%c0_14, %c74] : memref<3x470xbf16, #tpu.memory_space<vmem>>, vector<3x18xbf16>
    tpu.vector_store %arg9[%c0_14, %c74], %13 {strides = array<i32>} : memref<3x470xbf16, #tpu.memory_space<vmem>>, vector<3x18xbf16>,
    %c0_15 = arith.constant 0 : index
    %c0_16 = arith.constant 0 : index
    %c3 = arith.constant 3 : index
    %c0_17 = arith.constant 0 : index
    %15 = vector.load %arg2[%c0_15, %c0_16, %c3, %c0_17] : memref<1x3x24x18xbf16, #tpu.memory_space<vmem>>, vector<1x3x1x18xbf16>
    %16 = vector.shape_cast %15 : vector<1x3x1x18xbf16> to vector<3x18xbf16>
    %c0_18 = arith.constant 0 : index
    %c92 = arith.constant 92 : index
    %17 = vector.load %arg9[%c0_18, %c92] : memref<3x470xbf16, #tpu.memory_space<vmem>>, vector<3x18xbf16>
    tpu.vector_store %arg9[%c0_18, %c92], %16 {strides = array<i32>} : memref<3x470xbf16, #tpu.memory_space<vmem>>, vector<3x18xbf16>,
    %c0_19 = arith.constant 0 : index
    %c0_20 = arith.constant 0 : index
    %c4 = arith.constant 4 : index
    %c0_21 = arith.constant 0 : index
    %18 = vector.load %arg2[%c0_19, %c0_20, %c4, %c0_21] : memref<1x3x24x18xbf16, #tpu.memory_space<vmem>>, vector<1x3x1x18xbf16>
    %19 = vector.shape_cast %18 : vector<1x3x1x18xbf16> to vector<3x18xbf16>
    %c0_22 = arith.constant 0 : index
    %c110 = arith.constant 110 : index
    %20 = vector.load %arg9[%c0_22, %c110] : memref<3x470xbf16, #tpu.memory_space<vmem>>, vector<3x18xbf16>
    tpu.vector_store %arg9[%c0_22, %c110], %19 {strides = array<i32>} : memref<3x470xbf16, #tpu.memory_space<vmem>>, vector<3x18xbf16>,
    %c0_23 = arith.constant 0 : index
    %c0_24 = arith.constant 0 : index
    %c5 = arith.constant 5 : index
    %c0_25 = arith.constant 0 : index
    %21 = vector.load %arg2[%c0_23, %c0_24, %c5, %c0_25] : memref<1x3x24x18xbf16, #tpu.memory_space<vmem>>, vector<1x3x1x18xbf16>
    %22 = vector.shape_cast %21 : vector<1x3x1x18xbf16> to vector<3x18xbf16>
    %c0_26 = arith.constant 0 : index
    %c128 = arith.constant 128 : index
    %23 = vector.load %arg9[%c0_26, %c128] : memref<3x470xbf16, #tpu.memory_space<vmem>>, vector<3x18xbf16>
    tpu.vector_store %arg9[%c0_26, %c128], %22 {strides = array<i32>} : memref<3x470xbf16, #tpu.memory_space<vmem>>, vector<3x18xbf16>,
    %c0_27 = arith.constant 0 : index
    %c0_28 = arith.constant 0 : index
    %c6 = arith.constant 6 : index
    %c0_29 = arith.constant 0 : index
    %24 = vector.load %arg2[%c0_27, %c0_28, %c6, %c0_29] : memref<1x3x24x18xbf16, #tpu.memory_space<vmem>>, vector<1x3x1x18xbf16>
    %25 = vector.shape_cast %24 : vector<1x3x1x18xbf16> to vector<3x18xbf16>
    %c0_30 = arith.constant 0 : index
    %c146 = arith.constant 146 : index
    %26 = vector.load %arg9[%c0_30, %c146] : memref<3x470xbf16, #tpu.memory_space<vmem>>, vector<3x18xbf16>
    tpu.vector_store %arg9[%c0_30, %c146], %25 {strides = array<i32>} : memref<3x470xbf16, #tpu.memory_space<vmem>>, vector<3x18xbf16>,
    %c0_31 = arith.constant 0 : index
    %c0_32 = arith.constant 0 : index
    %c7 = arith.constant 7 : index
    %c0_33 = arith.constant 0 : index
    %27 = vector.load %arg2[%c0_31, %c0_32, %c7, %c0_33] : memref<1x3x24x18xbf16, #tpu.memory_space<vmem>>, vector<1x3x1x18xbf16>
    %28 = vector.shape_cast %27 : vector<1x3x1x18xbf16> to vector<3x18xbf16>
    %c0_34 = arith.constant 0 : index
    %c164 = arith.constant 164 : index
    %29 = vector.load %arg9[%c0_34, %c164] : memref<3x470xbf16, #tpu.memory_space<vmem>>, vector<3x18xbf16>
    tpu.vector_store %arg9[%c0_34, %c164], %28 {strides = array<i32>} : memref<3x470xbf16, #tpu.memory_space<vmem>>, vector<3x18xbf16>,
    %c0_35 = arith.constant 0 : index
    %c0_36 = arith.constant 0 : index
    %c8 = arith.constant 8 : index
    %c0_37 = arith.constant 0 : index
    %30 = vector.load %arg2[%c0_35, %c0_36, %c8, %c0_37] : memref<1x3x24x18xbf16, #tpu.memory_space<vmem>>, vector<1x3x1x18xbf16>
    %31 = vector.shape_cast %30 : vector<1x3x1x18xbf16> to vector<3x18xbf16>
    %c0_38 = arith.constant 0 : index
    %c182 = arith.constant 182 : index
    %32 = vector.load %arg9[%c0_38, %c182] : memref<3x470xbf16, #tpu.memory_space<vmem>>, vector<3x18xbf16>
    tpu.vector_store %arg9[%c0_38, %c182], %31 {strides = array<i32>} : memref<3x470xbf16, #tpu.memory_space<vmem>>, vector<3x18xbf16>,
    %c0_39 = arith.constant 0 : index
    %c0_40 = arith.constant 0 : index
    %c9 = arith.constant 9 : index
    %c0_41 = arith.constant 0 : index
    %33 = vector.load %arg2[%c0_39, %c0_40, %c9, %c0_41] : memref<1x3x24x18xbf16, #tpu.memory_space<vmem>>, vector<1x3x1x18xbf16>
    %34 = vector.shape_cast %33 : vector<1x3x1x18xbf16> to vector<3x18xbf16>
    %c0_42 = arith.constant 0 : index
    %c200 = arith.constant 200 : index
    %35 = vector.load %arg9[%c0_42, %c200] : memref<3x470xbf16, #tpu.memory_space<vmem>>, vector<3x18xbf16>
    tpu.vector_store %arg9[%c0_42, %c200], %34 {strides = array<i32>} : memref<3x470xbf16, #tpu.memory_space<vmem>>, vector<3x18xbf16>,
    %c0_43 = arith.constant 0 : index
    %c0_44 = arith.constant 0 : index
    %c10 = arith.constant 10 : index
    %c0_45 = arith.constant 0 : index
    %36 = vector.load %arg2[%c0_43, %c0_44, %c10, %c0_45] : memref<1x3x24x18xbf16, #tpu.memory_space<vmem>>, vector<1x3x1x18xbf16>
    %37 = vector.shape_cast %36 : vector<1x3x1x18xbf16> to vector<3x18xbf16>
    %c0_46 = arith.constant 0 : index
    %c218 = arith.constant 218 : index
    %38 = vector.load %arg9[%c0_46, %c218] : memref<3x470xbf16, #tpu.memory_space<vmem>>, vector<3x18xbf16>
    tpu.vector_store %arg9[%c0_46, %c218], %37 {strides = array<i32>} : memref<3x470xbf16, #tpu.memory_space<vmem>>, vector<3x18xbf16>,
    %c0_47 = arith.constant 0 : index
    %c0_48 = arith.constant 0 : index
    %c11 = arith.constant 11 : index
    %c0_49 = arith.constant 0 : index
    %39 = vector.load %arg2[%c0_47, %c0_48, %c11, %c0_49] : memref<1x3x24x18xbf16, #tpu.memory_space<vmem>>, vector<1x3x1x18xbf16>
    %40 = vector.shape_cast %39 : vector<1x3x1x18xbf16> to vector<3x18xbf16>
    %c0_50 = arith.constant 0 : index
    %c236 = arith.constant 236 : index
    %41 = vector.load %arg9[%c0_50, %c236] : memref<3x470xbf16, #tpu.memory_space<vmem>>, vector<3x18xbf16>
    tpu.vector_store %arg9[%c0_50, %c236], %40 {strides = array<i32>} : memref<3x470xbf16, #tpu.memory_space<vmem>>, vector<3x18xbf16>,
    %c0_51 = arith.constant 0 : index
    %c0_52 = arith.constant 0 : index
    %c12 = arith.constant 12 : index
    %c0_53 = arith.constant 0 : index
    %42 = vector.load %arg2[%c0_51, %c0_52, %c12, %c0_53] : memref<1x3x24x18xbf16, #tpu.memory_space<vmem>>, vector<1x3x1x18xbf16>
    %43 = vector.shape_cast %42 : vector<1x3x1x18xbf16> to vector<3x18xbf16>
    %c0_54 = arith.constant 0 : index
    %c254 = arith.constant 254 : index
    %44 = vector.load %arg9[%c0_54, %c254] : memref<3x470xbf16, #tpu.memory_space<vmem>>, vector<3x18xbf16>
    tpu.vector_store %arg9[%c0_54, %c254], %43 {strides = array<i32>} : memref<3x470xbf16, #tpu.memory_space<vmem>>, vector<3x18xbf16>,
    %c0_55 = arith.constant 0 : index
    %c0_56 = arith.constant 0 : index
    %c13 = arith.constant 13 : index
    %c0_57 = arith.constant 0 : index
    %45 = vector.load %arg2[%c0_55, %c0_56, %c13, %c0_57] : memref<1x3x24x18xbf16, #tpu.memory_space<vmem>>, vector<1x3x1x18xbf16>
    %46 = vector.shape_cast %45 : vector<1x3x1x18xbf16> to vector<3x18xbf16>
    %c0_58 = arith.constant 0 : index
    %c272 = arith.constant 272 : index
    %47 = vector.load %arg9[%c0_58, %c272] : memref<3x470xbf16, #tpu.memory_space<vmem>>, vector<3x18xbf16>
    tpu.vector_store %arg9[%c0_58, %c272], %46 {strides = array<i32>} : memref<3x470xbf16, #tpu.memory_space<vmem>>, vector<3x18xbf16>,
    %c0_59 = arith.constant 0 : index
    %c0_60 = arith.constant 0 : index
    %c14 = arith.constant 14 : index
    %c0_61 = arith.constant 0 : index
    %48 = vector.load %arg2[%c0_59, %c0_60, %c14, %c0_61] : memref<1x3x24x18xbf16, #tpu.memory_space<vmem>>, vector<1x3x1x18xbf16>
    %49 = vector.shape_cast %48 : vector<1x3x1x18xbf16> to vector<3x18xbf16>
    %c0_62 = arith.constant 0 : index
    %c290 = arith.constant 290 : index
    %50 = vector.load %arg9[%c0_62, %c290] : memref<3x470xbf16, #tpu.memory_space<vmem>>, vector<3x18xbf16>
    tpu.vector_store %arg9[%c0_62, %c290], %49 {strides = array<i32>} : memref<3x470xbf16, #tpu.memory_space<vmem>>, vector<3x18xbf16>,
    %c0_63 = arith.constant 0 : index
    %c0_64 = arith.constant 0 : index
    %c15 = arith.constant 15 : index
    %c0_65 = arith.constant 0 : index
    %51 = vector.load %arg2[%c0_63, %c0_64, %c15, %c0_65] : memref<1x3x24x18xbf16, #tpu.memory_space<vmem>>, vector<1x3x1x18xbf16>
    %52 = vector.shape_cast %51 : vector<1x3x1x18xbf16> to vector<3x18xbf16>
    %c0_66 = arith.constant 0 : index
    %c308 = arith.constant 308 : index
    %53 = vector.load %arg9[%c0_66, %c308] : memref<3x470xbf16, #tpu.memory_space<vmem>>, vector<3x18xbf16>
    tpu.vector_store %arg9[%c0_66, %c308], %52 {strides = array<i32>} : memref<3x470xbf16, #tpu.memory_space<vmem>>, vector<3x18xbf16>,
    %c0_67 = arith.constant 0 : index
    %c0_68 = arith.constant 0 : index
    %c16 = arith.constant 16 : index
    %c0_69 = arith.constant 0 : index
    %54 = vector.load %arg2[%c0_67, %c0_68, %c16, %c0_69] : memref<1x3x24x18xbf16, #tpu.memory_space<vmem>>, vector<1x3x1x18xbf16>
    %55 = vector.shape_cast %54 : vector<1x3x1x18xbf16> to vector<3x18xbf16>
    %c0_70 = arith.constant 0 : index
    %c326 = arith.constant 326 : index
    %56 = vector.load %arg9[%c0_70, %c326] : memref<3x470xbf16, #tpu.memory_space<vmem>>, vector<3x18xbf16>
    tpu.vector_store %arg9[%c0_70, %c326], %55 {strides = array<i32>} : memref<3x470xbf16, #tpu.memory_space<vmem>>, vector<3x18xbf16>,
    %c0_71 = arith.constant 0 : index
    %c0_72 = arith.constant 0 : index
    %c17 = arith.constant 17 : index
    %c0_73 = arith.constant 0 : index
    %57 = vector.load %arg2[%c0_71, %c0_72, %c17, %c0_73] : memref<1x3x24x18xbf16, #tpu.memory_space<vmem>>, vector<1x3x1x18xbf16>
    %58 = vector.shape_cast %57 : vector<1x3x1x18xbf16> to vector<3x18xbf16>
    %c0_74 = arith.constant 0 : index
    %c344 = arith.constant 344 : index
    %59 = vector.load %arg9[%c0_74, %c344] : memref<3x470xbf16, #tpu.memory_space<vmem>>, vector<3x18xbf16>
    tpu.vector_store %arg9[%c0_74, %c344], %58 {strides = array<i32>} : memref<3x470xbf16, #tpu.memory_space<vmem>>, vector<3x18xbf16>,
    %c0_75 = arith.constant 0 : index
    %c0_76 = arith.constant 0 : index
    %c18 = arith.constant 18 : index
    %c0_77 = arith.constant 0 : index
    %60 = vector.load %arg2[%c0_75, %c0_76, %c18, %c0_77] : memref<1x3x24x18xbf16, #tpu.memory_space<vmem>>, vector<1x3x1x18xbf16>
    %61 = vector.shape_cast %60 : vector<1x3x1x18xbf16> to vector<3x18xbf16>
    %c0_78 = arith.constant 0 : index
    %c362 = arith.constant 362 : index
    %62 = vector.load %arg9[%c0_78, %c362] : memref<3x470xbf16, #tpu.memory_space<vmem>>, vector<3x18xbf16>
    tpu.vector_store %arg9[%c0_78, %c362], %61 {strides = array<i32>} : memref<3x470xbf16, #tpu.memory_space<vmem>>, vector<3x18xbf16>,
    %c0_79 = arith.constant 0 : index
    %c0_80 = arith.constant 0 : index
    %c19 = arith.constant 19 : index
    %c0_81 = arith.constant 0 : index
    %63 = vector.load %arg2[%c0_79, %c0_80, %c19, %c0_81] : memref<1x3x24x18xbf16, #tpu.memory_space<vmem>>, vector<1x3x1x18xbf16>
    %64 = vector.shape_cast %63 : vector<1x3x1x18xbf16> to vector<3x18xbf16>
    %c0_82 = arith.constant 0 : index
    %c380 = arith.constant 380 : index
    %65 = vector.load %arg9[%c0_82, %c380] : memref<3x470xbf16, #tpu.memory_space<vmem>>, vector<3x18xbf16>
    tpu.vector_store %arg9[%c0_82, %c380], %64 {strides = array<i32>} : memref<3x470xbf16, #tpu.memory_space<vmem>>, vector<3x18xbf16>,
    %c0_83 = arith.constant 0 : index
    %c0_84 = arith.constant 0 : index
    %c20 = arith.constant 20 : index
    %c0_85 = arith.constant 0 : index
    %66 = vector.load %arg2[%c0_83, %c0_84, %c20, %c0_85] : memref<1x3x24x18xbf16, #tpu.memory_space<vmem>>, vector<1x3x1x18xbf16>
    %67 = vector.shape_cast %66 : vector<1x3x1x18xbf16> to vector<3x18xbf16>
    %c0_86 = arith.constant 0 : index
    %c398 = arith.constant 398 : index
    %68 = vector.load %arg9[%c0_86, %c398] : memref<3x470xbf16, #tpu.memory_space<vmem>>, vector<3x18xbf16>
    tpu.vector_store %arg9[%c0_86, %c398], %67 {strides = array<i32>} : memref<3x470xbf16, #tpu.memory_space<vmem>>, vector<3x18xbf16>,
    %c0_87 = arith.constant 0 : index
    %c0_88 = arith.constant 0 : index
    %c21 = arith.constant 21 : index
    %c0_89 = arith.constant 0 : index
    %69 = vector.load %arg2[%c0_87, %c0_88, %c21, %c0_89] : memref<1x3x24x18xbf16, #tpu.memory_space<vmem>>, vector<1x3x1x18xbf16>
    %70 = vector.shape_cast %69 : vector<1x3x1x18xbf16> to vector<3x18xbf16>
    %c0_90 = arith.constant 0 : index
    %c416 = arith.constant 416 : index
    %71 = vector.load %arg9[%c0_90, %c416] : memref<3x470xbf16, #tpu.memory_space<vmem>>, vector<3x18xbf16>
    tpu.vector_store %arg9[%c0_90, %c416], %70 {strides = array<i32>} : memref<3x470xbf16, #tpu.memory_space<vmem>>, vector<3x18xbf16>,
    %c0_91 = arith.constant 0 : index
    %c0_92 = arith.constant 0 : index
    %c22 = arith.constant 22 : index
    %c0_93 = arith.constant 0 : index
    %72 = vector.load %arg2[%c0_91, %c0_92, %c22, %c0_93] : memref<1x3x24x18xbf16, #tpu.memory_space<vmem>>, vector<1x3x1x18xbf16>
    %73 = vector.shape_cast %72 : vector<1x3x1x18xbf16> to vector<3x18xbf16>
    %c0_94 = arith.constant 0 : index
    %c434 = arith.constant 434 : index
    %74 = vector.load %arg9[%c0_94, %c434] : memref<3x470xbf16, #tpu.memory_space<vmem>>, vector<3x18xbf16>
    tpu.vector_store %arg9[%c0_94, %c434], %73 {strides = array<i32>} : memref<3x470xbf16, #tpu.memory_space<vmem>>, vector<3x18xbf16>,
    %c0_95 = arith.constant 0 : index
    %c0_96 = arith.constant 0 : index
    %c23 = arith.constant 23 : index
    %c0_97 = arith.constant 0 : index
    %75 = vector.load %arg2[%c0_95, %c0_96, %c23, %c0_97] : memref<1x3x24x18xbf16, #tpu.memory_space<vmem>>, vector<1x3x1x18xbf16>
    %76 = vector.shape_cast %75 : vector<1x3x1x18xbf16> to vector<3x18xbf16>
    %c0_98 = arith.constant 0 : index
    %c452 = arith.constant 452 : index
    %77 = vector.load %arg9[%c0_98, %c452] : memref<3x470xbf16, #tpu.memory_space<vmem>>, vector<3x18xbf16>
    tpu.vector_store %arg9[%c0_98, %c452], %76 {strides = array<i32>} : memref<3x470xbf16, #tpu.memory_space<vmem>>, vector<3x18xbf16>,
    %c0_99 = arith.constant 0 : index
    %c0_100 = arith.constant 0 : index
    %78 = vector.load %arg9[%c0_99, %c0_100] : memref<3x470xbf16, #tpu.memory_space<vmem>>, vector<3x432xbf16>
    %c0_101 = arith.constant 0 : index
    %c0_102 = arith.constant 0 : index
    %c0_103 = arith.constant 0 : index
    %79 = vector.load %arg4[%c0_101, %c0_102, %c0_103] : memref<9x32x3xbf16, #tpu.memory_space<vmem>>, vector<1x32x3xbf16>
    %80 = vector.shape_cast %79 : vector<1x32x3xbf16> to vector<32x3xbf16>
    %cst = arith.constant dense<0.000000e+00> : vector<32x432xf32>
    %81 = tpu.matmul %80, %78, %cst {dimension_numbers = #tpu.dot_dimension_numbers<[1], [0], [0], [1], [0, 0, 1, 1], [], []>} : vector<32x3xbf16>, vector<3x432xbf16>, vector<32x432xf32> -> vector<32x432xf32>
    %c0_104 = arith.constant 0 : index
    %c1_105 = arith.constant 1 : index
    %82 = vector.load %arg9[%c0_104, %c1_105] : memref<3x470xbf16, #tpu.memory_space<vmem>>, vector<3x432xbf16>
    %c1_106 = arith.constant 1 : index
    %c0_107 = arith.constant 0 : index
    %c0_108 = arith.constant 0 : index
    %83 = vector.load %arg4[%c1_106, %c0_107, %c0_108] : memref<9x32x3xbf16, #tpu.memory_space<vmem>>, vector<1x32x3xbf16>
    %84 = vector.shape_cast %83 : vector<1x32x3xbf16> to vector<32x3xbf16>
    %cst_109 = arith.constant dense<0.000000e+00> : vector<32x432xf32>
    %85 = tpu.matmul %84, %82, %cst_109 {dimension_numbers = #tpu.dot_dimension_numbers<[1], [0], [0], [1], [0, 0, 1, 1], [], []>} : vector<32x3xbf16>, vector<3x432xbf16>, vector<32x432xf32> -> vector<32x432xf32>
    %86 = arith.addf %81, %85 : vector<32x432xf32>
    %c0_110 = arith.constant 0 : index
    %c2_111 = arith.constant 2 : index
    %87 = vector.load %arg9[%c0_110, %c2_111] : memref<3x470xbf16, #tpu.memory_space<vmem>>, vector<3x432xbf16>
    %c2_112 = arith.constant 2 : index
    %c0_113 = arith.constant 0 : index
    %c0_114 = arith.constant 0 : index
    %88 = vector.load %arg4[%c2_112, %c0_113, %c0_114] : memref<9x32x3xbf16, #tpu.memory_space<vmem>>, vector<1x32x3xbf16>
    %89 = vector.shape_cast %88 : vector<1x32x3xbf16> to vector<32x3xbf16>
    %cst_115 = arith.constant dense<0.000000e+00> : vector<32x432xf32>
    %90 = tpu.matmul %89, %87, %cst_115 {dimension_numbers = #tpu.dot_dimension_numbers<[1], [0], [0], [1], [0, 0, 1, 1], [], []>} : vector<32x3xbf16>, vector<3x432xbf16>, vector<32x432xf32> -> vector<32x432xf32>
    %91 = arith.addf %86, %90 : vector<32x432xf32>
    %c0_116 = arith.constant 0 : index
    %c18_117 = arith.constant 18 : index
    %92 = vector.load %arg9[%c0_116, %c18_117] : memref<3x470xbf16, #tpu.memory_space<vmem>>, vector<3x432xbf16>
    %c3_118 = arith.constant 3 : index
    %c0_119 = arith.constant 0 : index
    %c0_120 = arith.constant 0 : index
    %93 = vector.load %arg4[%c3_118, %c0_119, %c0_120] : memref<9x32x3xbf16, #tpu.memory_space<vmem>>, vector<1x32x3xbf16>
    %94 = vector.shape_cast %93 : vector<1x32x3xbf16> to vector<32x3xbf16>
    %cst_121 = arith.constant dense<0.000000e+00> : vector<32x432xf32>
    %95 = tpu.matmul %94, %92, %cst_121 {dimension_numbers = #tpu.dot_dimension_numbers<[1], [0], [0], [1], [0, 0, 1, 1], [], []>} : vector<32x3xbf16>, vector<3x432xbf16>, vector<32x432xf32> -> vector<32x432xf32>
    %96 = arith.addf %91, %95 : vector<32x432xf32>
    %c0_122 = arith.constant 0 : index
    %c19_123 = arith.constant 19 : index
    %97 = vector.load %arg9[%c0_122, %c19_123] : memref<3x470xbf16, #tpu.memory_space<vmem>>, vector<3x432xbf16>
    %c4_124 = arith.constant 4 : index
    %c0_125 = arith.constant 0 : index
    %c0_126 = arith.constant 0 : index
    %98 = vector.load %arg4[%c4_124, %c0_125, %c0_126] : memref<9x32x3xbf16, #tpu.memory_space<vmem>>, vector<1x32x3xbf16>
    %99 = vector.shape_cast %98 : vector<1x32x3xbf16> to vector<32x3xbf16>
    %cst_127 = arith.constant dense<0.000000e+00> : vector<32x432xf32>
    %100 = tpu.matmul %99, %97, %cst_127 {dimension_numbers = #tpu.dot_dimension_numbers<[1], [0], [0], [1], [0, 0, 1, 1], [], []>} : vector<32x3xbf16>, vector<3x432xbf16>, vector<32x432xf32> -> vector<32x432xf32>
    %101 = arith.addf %96, %100 : vector<32x432xf32>
    %c0_128 = arith.constant 0 : index
    %c20_129 = arith.constant 20 : index
    %102 = vector.load %arg9[%c0_128, %c20_129] : memref<3x470xbf16, #tpu.memory_space<vmem>>, vector<3x432xbf16>
    %c5_130 = arith.constant 5 : index
    %c0_131 = arith.constant 0 : index
    %c0_132 = arith.constant 0 : index
    %103 = vector.load %arg4[%c5_130, %c0_131, %c0_132] : memref<9x32x3xbf16, #tpu.memory_space<vmem>>, vector<1x32x3xbf16>
    %104 = vector.shape_cast %103 : vector<1x32x3xbf16> to vector<32x3xbf16>
    %cst_133 = arith.constant dense<0.000000e+00> : vector<32x432xf32>
    %105 = tpu.matmul %104, %102, %cst_133 {dimension_numbers = #tpu.dot_dimension_numbers<[1], [0], [0], [1], [0, 0, 1, 1], [], []>} : vector<32x3xbf16>, vector<3x432xbf16>, vector<32x432xf32> -> vector<32x432xf32>
    %106 = arith.addf %101, %105 : vector<32x432xf32>
    %c0_134 = arith.constant 0 : index
    %c36 = arith.constant 36 : index
    %107 = vector.load %arg9[%c0_134, %c36] : memref<3x470xbf16, #tpu.memory_space<vmem>>, vector<3x432xbf16>
    %c6_135 = arith.constant 6 : index
    %c0_136 = arith.constant 0 : index
    %c0_137 = arith.constant 0 : index
    %108 = vector.load %arg4[%c6_135, %c0_136, %c0_137] : memref<9x32x3xbf16, #tpu.memory_space<vmem>>, vector<1x32x3xbf16>
    %109 = vector.shape_cast %108 : vector<1x32x3xbf16> to vector<32x3xbf16>
    %cst_138 = arith.constant dense<0.000000e+00> : vector<32x432xf32>
    %110 = tpu.matmul %109, %107, %cst_138 {dimension_numbers = #tpu.dot_dimension_numbers<[1], [0], [0], [1], [0, 0, 1, 1], [], []>} : vector<32x3xbf16>, vector<3x432xbf16>, vector<32x432xf32> -> vector<32x432xf32>
    %111 = arith.addf %106, %110 : vector<32x432xf32>
    %c0_139 = arith.constant 0 : index
    %c37 = arith.constant 37 : index
    %112 = vector.load %arg9[%c0_139, %c37] : memref<3x470xbf16, #tpu.memory_space<vmem>>, vector<3x432xbf16>
    %c7_140 = arith.constant 7 : index
    %c0_141 = arith.constant 0 : index
    %c0_142 = arith.constant 0 : index
    %113 = vector.load %arg4[%c7_140, %c0_141, %c0_142] : memref<9x32x3xbf16, #tpu.memory_space<vmem>>, vector<1x32x3xbf16>
    %114 = vector.shape_cast %113 : vector<1x32x3xbf16> to vector<32x3xbf16>
    %cst_143 = arith.constant dense<0.000000e+00> : vector<32x432xf32>
    %115 = tpu.matmul %114, %112, %cst_143 {dimension_numbers = #tpu.dot_dimension_numbers<[1], [0], [0], [1], [0, 0, 1, 1], [], []>} : vector<32x3xbf16>, vector<3x432xbf16>, vector<32x432xf32> -> vector<32x432xf32>
    %116 = arith.addf %111, %115 : vector<32x432xf32>
    %c0_144 = arith.constant 0 : index
    %c38_145 = arith.constant 38 : index
    %117 = vector.load %arg9[%c0_144, %c38_145] : memref<3x470xbf16, #tpu.memory_space<vmem>>, vector<3x432xbf16>
    %c8_146 = arith.constant 8 : index
    %c0_147 = arith.constant 0 : index
    %c0_148 = arith.constant 0 : index
    %118 = vector.load %arg4[%c8_146, %c0_147, %c0_148] : memref<9x32x3xbf16, #tpu.memory_space<vmem>>, vector<1x32x3xbf16>
    %119 = vector.shape_cast %118 : vector<1x32x3xbf16> to vector<32x3xbf16>
    %cst_149 = arith.constant dense<0.000000e+00> : vector<32x432xf32>
    %120 = tpu.matmul %119, %117, %cst_149 {dimension_numbers = #tpu.dot_dimension_numbers<[1], [0], [0], [1], [0, 0, 1, 1], [], []>} : vector<32x3xbf16>, vector<3x432xbf16>, vector<32x432xf32> -> vector<32x432xf32>
    %121 = arith.addf %116, %120 : vector<32x432xf32>
    %c0_150 = arith.constant 0 : index
    %c0_151 = arith.constant 0 : index
    %122 = vector.load %arg5[%c0_150, %c0_151] : memref<32x1xf32, #tpu.memory_space<vmem>>, vector<32x1xf32>
    %123 = vector.broadcast %122 : vector<32x1xf32> to vector<32x432xf32>
    %124 = arith.addf %121, %123 : vector<32x432xf32>
    %cst_152 = arith.constant 0.000000e+00 : f32
    %125 = vector.broadcast %cst_152 : f32 to vector<32x432xf32>
    %126 = arith.maximumf %124, %125 : vector<32x432xf32>
    %127 = tpu.iota {dimensions = array<i32: 1>} : vector<1x432xi32>
    %c432_i32 = arith.constant 432 : i32
    %128 = arith.muli %arg1, %c432_i32 : i32
    %c38_i32 = arith.constant 38 : i32
    %129 = arith.subi %c38_i32, %128 : i32
    %c432_i32_153 = arith.constant 432 : i32
    %130 = arith.muli %arg1, %c432_i32_153 : i32
    %c326_i32 = arith.constant 326 : i32
    %131 = arith.subi %c326_i32, %130 : i32
    %132 = vector.broadcast %129 : i32 to vector<1x432xi32>
    %133 = arith.cmpi sge, %127, %132 : vector<1x432xi32>
    %134 = vector.broadcast %131 : i32 to vector<1x432xi32>
    %135 = arith.cmpi slt, %127, %134 : vector<1x432xi32>
    %136 = arith.andi %133, %135 : vector<1x432xi1>
    %c0_154 = arith.constant 0 : index
    %c0_155 = arith.constant 0 : index
    %137 = vector.load %arg3[%c0_154, %c0_155] : memref<1x432xf32, #tpu.memory_space<vmem>>, vector<1x432xf32>
    %cst_156 = arith.constant 0.000000e+00 : f32
    %138 = vector.broadcast %cst_156 : f32 to vector<1x432xf32>
    %139 = arith.select %136, %137, %138 : vector<1x432xi1>, vector<1x432xf32>
    %c0_157 = arith.constant 0 : index
    %c0_158 = arith.constant 0 : index
    %140 = vector.load %arg10[%c0_157, %c0_158] : memref<32x432xf32, #tpu.memory_space<vmem>>, vector<32x432xf32>
    %141 = vector.broadcast %139 : vector<1x432xf32> to vector<32x432xf32>
    %142 = arith.mulf %126, %141 : vector<32x432xf32>
    %143 = arith.addf %140, %142 : vector<32x432xf32>
    %c0_159 = arith.constant 0 : index
    %c0_160 = arith.constant 0 : index
    %144 = vector.load %arg10[%c0_159, %c0_160] : memref<32x432xf32, #tpu.memory_space<vmem>>, vector<32x432xf32>
    tpu.vector_store %arg10[%c0_159, %c0_160], %143 {strides = array<i32>} : memref<32x432xf32, #tpu.memory_space<vmem>>, vector<32x432xf32>,
    %c0_i32_161 = arith.constant 0 : i32
    %145 = arith.cmpi eq, %arg1, %c0_i32_161 : i32
    %146 = arith.extui %145 : i1 to i32
    %c0_i32_162 = arith.constant 0 : i32
    %147 = arith.cmpi ne, %146, %c0_i32_162 : i32
    scf.if %147 {
      %c0_163 = arith.constant 0 : index
      %c0_164 = arith.constant 0 : index
      %148 = vector.load %arg10[%c0_163, %c0_164] : memref<32x432xf32, #tpu.memory_space<vmem>>, vector<32x432xf32>
      %cst_165 = arith.constant dense<0.000000e+00> : vector<32xf32>
      %149 = vector.multi_reduction <add>, %148, %cst_165 [1] : vector<32x432xf32> to vector<32xf32>
      %150 = vector.shape_cast %149 : vector<32xf32> to vector<32x1xf32>
      %cst_166 = arith.constant 3.906250e-03 : f32
      %151 = vector.broadcast %cst_166 : f32 to vector<32x1xf32>
      %152 = arith.mulf %150, %151 : vector<32x1xf32>
      %c0_167 = arith.constant 0 : index
      %c0_168 = arith.constant 0 : index
      %153 = vector.load %arg6[%c0_167, %c0_168] : memref<2x32xf32, #tpu.memory_space<vmem>>, vector<2x32xf32>
      %cst_169 = arith.constant dense<0.000000e+00> : vector<2x1xf32>
      %154 = tpu.matmul %153, %152, %cst_169 {dimension_numbers = #tpu.dot_dimension_numbers<[1], [0], [0], [1], [0, 0, 1, 1], [], []>} : vector<2x32xf32>, vector<32x1xf32>, vector<2x1xf32> -> vector<2x1xf32>
      %c0_170 = arith.constant 0 : index
      %c0_171 = arith.constant 0 : index
      %155 = vector.load %arg7[%c0_170, %c0_171] : memref<2x1xf32, #tpu.memory_space<vmem>>, vector<2x1xf32>
      %156 = arith.addf %154, %155 : vector<2x1xf32>
      %c0_172 = arith.constant 0 : index
      %c0_173 = arith.constant 0 : index
      %c0_174 = arith.constant 0 : index
      %157 = vector.load %arg8[%c0_172, %c0_173, %c0_174] : memref<1x2x1xf32, #tpu.memory_space<vmem>>, vector<1x2x1xf32>
      %158 = vector.shape_cast %157 : vector<1x2x1xf32> to vector<2x1xf32>
      %159 = vector.shape_cast %156 : vector<2x1xf32> to vector<1x2x1xf32>
      tpu.vector_store %arg8[%c0_172, %c0_173, %c0_174], %159 {strides = array<i32>} : memref<1x2x1xf32, #tpu.memory_space<vmem>>, vector<1x2x1xf32>,
    } else {
    }
    return
  }
  func.func @transform_0(%arg0: i32, %arg1: i32) -> (i32, i32, i32, i32) {
    %c0_i32 = arith.constant 0 : i32
    %c0_i32_0 = arith.constant 0 : i32
    %c0_i32_1 = arith.constant 0 : i32
    return %arg0, %c0_i32, %arg1, %c0_i32_0 : i32, i32, i32, i32
  }
  func.func @transform_1(%arg0: i32, %arg1: i32) -> (i32, i32) {
    %c0_i32 = arith.constant 0 : i32
    %c0_i32_0 = arith.constant 0 : i32
    %c0_i32_1 = arith.constant 0 : i32
    return %c0_i32, %c0_i32_0 : i32, i32
  }
  func.func @transform_2(%arg0: i32, %arg1: i32) -> (i32, i32, i32) {
    %c0_i32 = arith.constant 0 : i32
    %c0_i32_0 = arith.constant 0 : i32
    %c0_i32_1 = arith.constant 0 : i32
    %c0_i32_2 = arith.constant 0 : i32
    return %c0_i32, %c0_i32_0, %c0_i32_1 : i32, i32, i32
  }
  func.func @transform_3(%arg0: i32, %arg1: i32) -> (i32, i32) {
    %c0_i32 = arith.constant 0 : i32
    %c0_i32_0 = arith.constant 0 : i32
    %c0_i32_1 = arith.constant 0 : i32
    return %c0_i32, %c0_i32_0 : i32, i32
  }
  func.func @transform_4(%arg0: i32, %arg1: i32) -> (i32, i32) {
    %c0_i32 = arith.constant 0 : i32
    %c0_i32_0 = arith.constant 0 : i32
    %c0_i32_1 = arith.constant 0 : i32
    return %c0_i32, %c0_i32_0 : i32, i32
  }
  func.func @transform_5(%arg0: i32, %arg1: i32) -> (i32, i32) {
    %c0_i32 = arith.constant 0 : i32
    %c0_i32_0 = arith.constant 0 : i32
    %c0_i32_1 = arith.constant 0 : i32
    return %c0_i32, %c0_i32_0 : i32, i32
  }
  func.func @transform_6(%arg0: i32, %arg1: i32) -> (i32, i32, i32) {
    %c0_i32 = arith.constant 0 : i32
    %c0_i32_0 = arith.constant 0 : i32
    %c0_i32_1 = arith.constant 0 : i32
    return %arg0, %c0_i32, %c0_i32_0 : i32, i32, i32
  }
}

</mosaic_0001>

<bundles_post_ra>
// kernel: cls_model_forward.1
= control target key start
LH: loop header
LB: loop body
LE: loop exit
PB: predicated region body
PF: predicated region fallthrough
CT: control target
= control target key end

     0   :  { %s4559_s21 = smov 0   ;;  %s4561_s22 = smov 0   ;;  %s5141_s0 = inlined_call_operand.vmem [shape: bf16[2,3,24,18], index: 0, kind: input, shape index: {}]   ;;  %s5142_s1 = inlined_call_operand.vmem [shape: f32[1,432], index: 1, kind: input, shape index: {}]   ;;  %s5143_s2 = inlined_call_operand.vmem [shape: bf16[9,32,3], index: 2, kind: input, shape index: {}]   ;;  %s5144_s3 = inlined_call_operand.vmem [shape: f32[32,1], index: 3, kind: input, shape index: {}]   ;;  %s5145_s4 = inlined_call_operand.vmem [shape: f32[2,32], index: 4, kind: input, shape index: {}]   ;;  %s5146_s5 = inlined_call_operand.vmem [shape: f32[2,1], index: 5, kind: input, shape index: {}]   ;;  %s5147_s6 = inlined_call_operand.vmem [shape: f32[2,2,1], index: 6, kind: output, shape index: {}]  }
   0x1   :  { %s4563_s23 = smov 0  }
   0x2 LB: > { %s28_s24 = sadd.s32 1, %s4486_s22  ;;  %p4076_p0 = scmp.ge.s32.totalorder %s4490_s23, 1  ;;  %s4490_s23 = sphi %s4563_s23, %s16_s23   ;;  %s4486_s22 = sphi %s4561_s22, %s5151_s22   ;;  %s4482_s21 = sphi %s4559_s21, %s5150_s21  }
   0x3   : > { %p30_p1 = scmp.ge.s32.totalorder %s28_s24, 2  ;;  %p231_p2 = scmp.lt.s32.totalorder %s4490_s23, 3 }
   0x5   : > { %s5153_s24 = smov (%p30_p1, %s28_s24), 0  ;;  %p232_p3 = pnand %p4076_p0, %p231_p2 }
   0x6   : > { %p265_p4 = scmp.lt.s32.totalorder (!%p232_p3), %s4482_s21, 1  ;;  %v351_v0 = vlaneseq (!%p232_p3)  ;;  %v4492_v1 = vmov (!%p232_p3), 1983009808   ;;  %vm373_vm0 = vcmask (!%p232_p3), 1041409   ;;  %vm376_vm1 = vcmask (!%p232_p3), 1042434   ;;  %s4493_s29 = smov (!%p232_p3), 18  }
   0x7   : > { %235 = sbr.rel (%p232_p3) target bundleno = 1176 (0x498), region = 44  ;;  %v349_v2 = vunpack.c.l.s4 (!%p232_p3), %v4492_v1  ;;  %s4494_s30 = smov (!%p232_p3), 54   ;;  %vm284_vm2 = vsmask.f32 (!%p232_p3), 1280  ;;  %vm750_vm3 = vcmask (!%p232_p3), 140288   ;;  %vm283_vm5 = vcmask (!%p232_p3), 304128  }
   0x8   : > { %v4580_v3 = vshrl.u32 (!%p232_p3), %v351_v0, 7  ;;  %s4495_s7 = smov (!%p232_p3), 36   ;;  %s4496_s8 = smov (!%p232_p3), 72   ;;  %vm4720_vm4 = vmand (!%p232_p3), %vm750_vm3, %vm284_vm2  ;;  %vm824_vm7 = vcmask (!%p232_p3), 287888   ;;  %vm899_vm9 = vcmask (!%p232_p3), 435488   ;;  %vm970_vm11 = vcmask (!%p232_p3), 583088  }
   0x9   : > { %v350_v4 = vunpack.c.0.s8 (!%p232_p3), %v349_v2  ;;  %s4497_s9 = smov (!%p232_p3), 90   ;;  %s4498_s10 = smov (!%p232_p3), 108   ;;  %vm285_vm6 = vmand (!%p232_p3), %vm283_vm5, %vm284_vm2  ;;  %vm1041_vm13 = vcmask (!%p232_p3), 730688   ;;  %vm1112_vm15 = vcmask (!%p232_p3), 878288   ;;  %vm461_vm5 = vcmask (!%p232_p3), 599488  }
   0xa   : > { %s4499_s11 = smov (!%p232_p3), 16   ;;  %s4500_s12 = smov (!%p232_p3), 126   ;;  %vm825_vm8 = vmand (!%p232_p3), %vm824_vm7, %vm284_vm2 }
   0xb   : > { %v4589_v5 = vsub.s32 (!%p232_p3), %v350_v4, %v4580_v3  ;;  %s4501_s13 = smov (!%p232_p3), 52   ;;  %s4502_s14 = smov (!%p232_p3), 34   ;;  %vm900_vm10 = vmand (!%p232_p3), %vm899_vm9, %vm284_vm2  ;;  %vm1263_vm9 = vcmask (!%p232_p3), 125954  }
   0xc   : > { %s4503_s15 = smov (!%p232_p3), 88   ;;  %s4504_s16 = smov (!%p232_p3), 70   ;;  %vm971_vm12 = vmand (!%p232_p3), %vm970_vm11, %vm284_vm2 }
   0xd   : > { %s4505_s17 = smov (!%p232_p3), 124   ;;  %s4506_s18 = smov (!%p232_p3), 106   ;;  %vm1042_vm14 = vmand (!%p232_p3), %vm1041_vm13, %vm284_vm2  ;;  %vm532_vm13 = vcmask (!%p232_p3), 747088  }
   0xe   : > { %s5155_s21 = smov (!%p265_p4, %s4482_s21), 1  ;;  %s4507_s19 = smov 38   ;;  %vm462_vm7 = vmand %vm461_vm5, %vm284_vm2 }
   0xf   : > { %s4390_s25 = smul.u32 36, %s5155_s21  ;;  %s4508_s20 = smov 56  }
  0x10   : > { %s4510_s26 = smov 74   ;;  %s4511_s27 = smov 32  }
  0x11   : > { %s4586_s28 = scalar_lea.vmem %s5141_s0, %s4390_s25  ;;  %s4509_s25 = smov 14  }
  0x12   : > { %v4097_v6 = vld.sshfl [vmem:[%s4586_s28] sm:$0x20 pattern:$0x76325410] }
  0x13   : > { %v4098_v7 = vld.sshfl [vmem:[%s4586_s28 + $0xc] sm:$0x20 pattern:$0x76325410]  ;;  %v768_v8 = vcombine.high %v4097_v6, %v4097_v6 }
  0x14   : > { %v4099_v9 = vld.sshfl [vmem:[%s4586_s28 + $0x18] sm:$0x20 pattern:$0x76325410]  ;;  %v776_v10 = vcombine.high %v4098_v7, %v4098_v7 }
  0x15   : > { %v784_v11 = vcombine.high %v4099_v9, %v4099_v9  ;;  %v791_v12 = vrot.slane %v768_v8, %v4589_v5  ;;  %v4103_v13 = vld.sshfl [vmem:[%s4586_s28 + $0x4] sm:$0x1 pattern:$0x76325410] }
  0x16   : > { %v798_v14 = vrot.slane %v776_v10, %v4589_v5  ;;  %v4104_v15 = vld.sshfl [vmem:[%s4586_s28 + $0x10] sm:$0x1 pattern:$0x76325410]  ;;  %v937_v16 = vrot.slane %v4103_v13, %v4589_v5 }
  0x17   : > { %v805_v17 = vrot.slane %v784_v11, %v4589_v5  ;;  %v806_v18 = vunpack.c.l.b16 %v791_v12  ;;  %v4105_v19 = vld.sshfl [vmem:[%s4586_s28 + $0x1c] sm:$0x1 pattern:$0x76325410]  ;;  %v944_v20 = vrot.slane %v4104_v15, %v4589_v5 }
  0x18   : > { %v807_v21 = vunpack.c.l.b16 %v798_v14  ;;  %v951_v22 = vrot.slane %v4105_v19, %v4589_v5  ;;  %v952_v23 = vunpack.c.l.b16 %v937_v16  ;;  %v4109_v24 = vld.sshfl [vmem:[%s4586_s28 + $0x4] sm:$0x2 pattern:$0x76325410] }
  0x19   : > { %v808_v25 = vunpack.c.l.b16 %v805_v17  ;;  %v809_v26 = vrot.slane %v806_v18, 2  ;;  %v883_v27 = vrot.slane %v806_v18, 3  ;;  %v953_v28 = vunpack.c.l.b16 %v944_v20  ;;  %v4110_v29 = vld.sshfl [vmem:[%s4586_s28 + $0x10] sm:$0x2 pattern:$0x76325410] }
  0x1a   : > { %v810_v30 = vrot.slane %v807_v21, 1  ;;  %v884_v31 = vrot.slane %v807_v21, 2  ;;  %v954_v32 = vunpack.c.l.b16 %v951_v22  ;;  %v1026_v33 = vrot.slane %v952_v23, 1 }
  0x1b   : > { %v886_v34 = vrot.slane %v808_v25, 1  ;;  %v955_v35 = vrot.slane %v953_v28, 7  ;;  %v4111_v36 = vld.sshfl [vmem:[%s4586_s28 + $0x1c] sm:$0x2 pattern:$0x76325410]  ;;  %v1079_v37 = vrot.slane %v4109_v24, %v4589_v5  ;;  %v1086_v38 = vrot.slane %v4110_v29, %v4589_v5 }
  0x1c   : > { %v811_v39 = vsel %vm373_vm0, %v810_v30, %v809_v26  ;;  %v885_v40 = vsel %vm373_vm0, %v884_v31, %v883_v27  ;;  %v957_v41 = vrot.slane %v954_v32, 6  ;;  %v1027_v42 = vsel %vm373_vm0, %v953_v28, %v1026_v33  ;;  %v4115_v47 = vld.sshfl [vmem:[%s4586_s28 + $0x4] sm:$0x10 pattern:$0x76325410] }
  0x1d   : > { %v812_v43 = vsel %vm376_vm1, %v808_v25, %v811_v39  ;;  %v887_v44 = vsel %vm376_vm1, %v886_v34, %v885_v40  ;;  %v956_v45 = vsel %vm373_vm0, %v955_v35, %v952_v23  ;;  %v1028_v46 = vrot.slane %v954_v32, 7  ;;  %v4116_v52 = vld.sshfl [vmem:[%s4586_s28 + $0x10] sm:$0x10 pattern:$0x76325410] }
  0x1e   : > { %v813_v48 = vpack.c.b16 %v812_v43, %v812_v43  ;;  %v888_v49 = vpack.c.b16 %v887_v44, %v887_v44  ;;  %v958_v50 = vsel %vm376_vm1, %v957_v41, %v956_v45  ;;  %v1093_v51 = vrot.slane %v4111_v36, %v4589_v5  ;;  %v4117_v53 = vld.sshfl [vmem:[%s4586_s28 + $0x1c] sm:$0x10 pattern:$0x76325410] }
  0x1f   : > { %v959_v54 = vpack.c.b16 %v958_v50, %v958_v50  ;;  %v1029_v55 = vsel %vm376_vm1, %v1028_v46, %v1027_v42  ;;  %v1094_v56 = vunpack.c.l.b16 %v1079_v37  ;;  %v1095_v57 = vunpack.c.l.b16 %v1086_v38  ;;  %v4121_v58 = vld.sshfl [vmem:[%s4586_s28 + $0x4] sm:$0x20 pattern:$0x76325410] }
  0x20   : > { %v820_v59 = vrot.slane %v813_v48, %v4589_v5  ;;  %v895_v60 = vrot.slane %v888_v49, %v4589_v5  ;;  %v1030_v61 = vpack.c.b16 %v1029_v55, %v1029_v55  ;;  %v1096_v62 = vunpack.c.l.b16 %v1093_v51  ;;  %v4122_v63 = vld.sshfl [vmem:[%s4586_s28 + $0x10] sm:$0x20 pattern:$0x76325410] }
  0x21   : > { %v966_v1 = vrot.slane %v959_v54, %v4589_v5  ;;  %v1097_v2 = vrot.slane %v1094_v56, 2  ;;  %v1098_v4 = vrot.slane %v1095_v57, 1  ;;  %v1168_v6 = vrot.slane %v1094_v56, 3 }
  0x22   : > { %821 = vrot.lane.b32.xlu0 %v820_v59, %s4493_s29  ;;  %v1037_v7 = vrot.slane %v1030_v61, %v4589_v5  ;;  %v1169_v8 = vrot.slane %v1095_v57, 2  ;;  %v1171_v9 = vrot.slane %v1096_v62, 1  ;;  %v1202_v10 = vcombine.high %v4115_v47, %v4115_v47  ;;  %v4123_v14 = vld.sshfl [vmem:[%s4586_s28 + $0x1c] sm:$0x20 pattern:$0x76325410] }
  0x23   : > { %967 = vrot.lane.b32.xlu1 %v966_v1, %s4494_s30  ;;  %v1099_v11 = vsel %vm373_vm0, %v1098_v4, %v1097_v2  ;;  %v1210_v12 = vcombine.high %v4116_v52, %v4116_v52  ;;  %v1218_v13 = vcombine.high %v4117_v53, %v4117_v53  ;;  %v1357_v15 = vcombine.high %v4121_v58, %v4121_v58  ;;  %v4127_v36 = vld.sshfl [vmem:[%s4586_s28 + $0x8] sm:$0x1 pattern:$0x76325410]  ;;  %s4513_s29 = smov 50   ;;  %s4514_s30 = smov 110  }
  0x24   : > { %v1100_v16 = vsel %vm376_vm1, %v1096_v62, %v1099_v11  ;;  %v1170_v17 = vsel %vm373_vm0, %v1169_v8, %v1168_v6  ;;  %v1225_v18 = vrot.slane %v1202_v10, %v4589_v5  ;;  %v1365_v19 = vcombine.high %v4122_v63, %v4122_v63  ;;  %v4128_v45 = vld.sshfl [vmem:[%s4586_s28 + $0x14] sm:$0x1 pattern:$0x76325410] }
  0x25   : > { %v1101_v20 = vpack.c.b16 %v1100_v16, %v1100_v16  ;;  %v1172_v21 = vsel %vm376_vm1, %v1171_v9, %v1170_v17  ;;  %v1232_v22 = vrot.slane %v1210_v12, %v4589_v5  ;;  %v1239_v23 = vrot.slane %v1218_v13, %v4589_v5  ;;  %v4129_v50 = vld.sshfl [vmem:[%s4586_s28 + $0x20] sm:$0x1 pattern:$0x76325410] }
  0x26   : > { %896 = vrot.lane.b32.xlu0 %v895_v60, %s4495_s7  ;;  %v1173_v24 = vpack.c.b16 %v1172_v21, %v1172_v21  ;;  %v1240_v25 = vunpack.c.l.b16 %v1225_v18  ;;  %v1373_v26 = vcombine.high %v4123_v14, %v4123_v14  ;;  %v1380_v27 = vrot.slane %v1357_v15, %v4589_v5  ;;  %v4133_v55 = vld.sshfl [vmem:[%s4586_s28 + $0x8] sm:$0x2 pattern:$0x76325410]  ;;  %s4515_s7 = smov 68  }
  0x27   : > { %1038 = vrot.lane.b32.xlu1 %v1037_v7, %s4496_s8  ;;  %v1108_v28 = vrot.slane %v1101_v20, %v4589_v5  ;;  %v1241_v29 = vunpack.c.l.b16 %v1232_v22  ;;  %v1242_v30 = vunpack.c.l.b16 %v1239_v23  ;;  %v1387_v31 = vrot.slane %v1365_v19, %v4589_v5  ;;  %v4134_v60 = vld.sshfl [vmem:[%s4586_s28 + $0x14] sm:$0x2 pattern:$0x76325410]  ;;  %s4517_s8 = smov 127  }
  0x28   : > { %v1180_v32 = vrot.slane %v1173_v24, %v4589_v5  ;;  %v1324_v33 = vrot.slane %v1240_v25, 1  ;;  %v1394_v34 = vrot.slane %v1373_v26, %v4589_v5  ;;  %v1395_v35 = vunpack.c.l.b16 %v1380_v27  ;;  %v4135_v2 = vld.sshfl [vmem:[%s4586_s28 + $0x20] sm:$0x2 pattern:$0x76325410] }
  0x29   : > { %v1243_v37 = vrot.slane %v1241_v29, 7  ;;  %v1245_v38 = vrot.slane %v1242_v30, 6  ;;  %v1326_v39 = vrot.slane %v1242_v30, 7  ;;  %v1396_v40 = vunpack.c.l.b16 %v1387_v31 }
  0x2a   : > { %1109 = vrot.lane.b32.xlu0 %v1108_v28, %s4497_s9  ;;  %v1325_v41 = vsel %vm373_vm0, %v1241_v29, %v1324_v33  ;;  %v1397_v42 = vunpack.c.l.b16 %v1394_v34  ;;  %v1398_v43 = vrot.slane %v1395_v35, 2  ;;  %v1472_v44 = vrot.slane %v1395_v35, 3  ;;  %v4094_v13 = vld.sshfl [vmem:[%s4586_s28] sm:$0x10 pattern:$0x76325410] }
  0x2b   : > { %1181 = vrot.lane.b32.xlu1 %v1180_v32, %s4498_s10  ;;  %v1244_v46 = vsel %vm373_vm0, %v1243_v37, %v1240_v25  ;;  %v1327_v47 = vsel %vm376_vm1, %v1326_v39, %v1325_v41  ;;  %v1399_v48 = vrot.slane %v1396_v40, 1  ;;  %v1473_v49 = vrot.slane %v1396_v40, 2  ;;  %v4095_v18 = vld.sshfl [vmem:[%s4586_s28 + $0xc] sm:$0x10 pattern:$0x76325410] }
  0x2c   : > { %v1246_v51 = vsel %vm376_vm1, %v1245_v38, %v1244_v46  ;;  %v1328_v52 = vpack.c.b16 %v1327_v47, %v1327_v47  ;;  %v1475_v53 = vrot.slane %v1397_v42, 1  ;;  %v1526_v54 = vrot.slane %v4127_v36, %v4589_v5  ;;  %v4096_v26 = vld.sshfl [vmem:[%s4586_s28 + $0x18] sm:$0x10 pattern:$0x76325410] }
  0x2d   : > { %v1247_v56 = vpack.c.b16 %v1246_v51, %v1246_v51  ;;  %v1400_v57 = vsel %vm373_vm0, %v1399_v48, %v1398_v43  ;;  %v1474_v58 = vsel %vm373_vm0, %v1473_v49, %v1472_v44  ;;  %v1533_v59 = vrot.slane %v4128_v45, %v4589_v5  ;;  %v4079_v36 = vld.sshfl [vmem:[%s4586_s28] sm:$0x1 pattern:$0x76325410] }
  0x2e   : > { %v1335_v61 = vrot.slane %v1328_v52, %v4589_v5  ;;  %v1401_v62 = vsel %vm376_vm1, %v1397_v42, %v1400_v57  ;;  %v1476_v63 = vsel %vm376_vm1, %v1475_v53, %v1474_v58  ;;  %v1540_v1 = vrot.slane %v4129_v50, %v4589_v5  ;;  %v4080_v37 = vld.sshfl [vmem:[%s4586_s28 + $0xc] sm:$0x1 pattern:$0x76325410] }
  0x2f   : > { %v1254_v4 = vrot.slane %v1247_v56, %v4589_v5  ;;  %v1402_v6 = vpack.c.b16 %v1401_v62, %v1401_v62  ;;  %v1477_v7 = vpack.c.b16 %v1476_v63, %v1476_v63  ;;  %v1541_v8 = vunpack.c.l.b16 %v1526_v54  ;;  %v4081_v42 = vld.sshfl [vmem:[%s4586_s28 + $0x18] sm:$0x1 pattern:$0x76325410] }
  0x30   : > { %1336 = vrot.lane.b32.xlu1 %v1335_v61, %s4499_s11  ;;  %v1542_v9 = vunpack.c.l.b16 %v1533_v59  ;;  %v1543_v10 = vunpack.c.l.b16 %v1540_v1  ;;  %v1668_v11 = vrot.slane %v4133_v55, %v4589_v5  ;;  %v1675_v12 = vrot.slane %v4134_v60, %v4589_v5  ;;  %v4139_v47 = vld.sshfl [vmem:[%s4586_s28 + $0x8] sm:$0x10 pattern:$0x76325410]  ;;  %s4518_s11 = smov 109  }
  0x31   : > { %1255 = vrot.lane.b32.xlu0 %v1254_v4, %s4500_s12  ;;  %v1409_v14 = vrot.slane %v1402_v6, %v4589_v5  ;;  %v1484_v15 = vrot.slane %v1477_v7, %v4589_v5  ;;  %v1615_v16 = vrot.slane %v1541_v8, 1  ;;  %v1682_v17 = vrot.slane %v4135_v2, %v4589_v5  ;;  %v4140_v52 = vld.sshfl [vmem:[%s4586_s28 + $0x14] sm:$0x10 pattern:$0x76325410] }
  0x32   : > { %v1544_v19 = vrot.slane %v1542_v9, 7  ;;  %v1546_v20 = vrot.slane %v1543_v10, 6  ;;  %v1617_v21 = vrot.slane %v1543_v10, 7  ;;  %v1683_v22 = vunpack.c.l.b16 %v1668_v11 }
  0x33   : > { %v1616_v23 = vsel %vm373_vm0, %v1542_v9, %v1615_v16  ;;  %v1684_v24 = vunpack.c.l.b16 %v1675_v12  ;;  %v1685_v25 = vunpack.c.l.b16 %v1682_v17  ;;  %v696_v27 = vcombine.high %v4094_v13, %v4094_v13  ;;  %v4141_v57 = vld.sshfl [vmem:[%s4586_s28 + $0x20] sm:$0x10 pattern:$0x76325410] }
  0x34   : > { %1485 = vrot.lane.b32.xlu1 %v1484_v15, %s4501_s13  ;;  %v1545_v28 = vsel %vm373_vm0, %v1544_v19, %v1541_v8  ;;  %v1618_v29 = vsel %vm376_vm1, %v1617_v21, %v1616_v23  ;;  %v1686_v30 = vrot.slane %v1683_v22, 2  ;;  %v1757_v31 = vrot.slane %v1683_v22, 3  ;;  %v4085_v17 = vld.sshfl [vmem:[%s4586_s28] sm:$0x2 pattern:$0x76325410] }
  0x35   : > { %1410 = vrot.lane.b32.xlu0 %v1409_v14, %s4502_s14  ;;  %v1547_v32 = vsel %vm376_vm1, %v1546_v20, %v1545_v28  ;;  %v1619_v33 = vpack.c.b16 %v1618_v29, %v1618_v29  ;;  %v1687_v34 = vrot.slane %v1684_v24, 1  ;;  %v1758_v35 = vrot.slane %v1684_v24, 2  ;;  %v4086_v22 = vld.sshfl [vmem:[%s4586_s28 + $0xc] sm:$0x2 pattern:$0x76325410] }
  0x36   : > { %v1548_v38 = vpack.c.b16 %v1547_v32, %v1547_v32  ;;  %v1760_v39 = vrot.slane %v1685_v25, 1  ;;  %v704_v40 = vcombine.high %v4095_v18, %v4095_v18  ;;  %v712_v41 = vcombine.high %v4096_v26, %v4096_v26  ;;  %v4087_v26 = vld.sshfl [vmem:[%s4586_s28 + $0x18] sm:$0x2 pattern:$0x76325410] }
  0x37   : > { %v1626_v43 = vrot.slane %v1619_v33, %v4589_v5  ;;  %v1688_v44 = vsel %vm373_vm0, %v1687_v34, %v1686_v30  ;;  %v1759_v45 = vsel %vm373_vm0, %v1758_v35, %v1757_v31  ;;  %v4680_v46 = vrot.slane %v696_v27, %v4589_v5  ;;  %v752_v28 = vld [vmem:[#allocation2 + $0x2] sm:$0x3] }
  0x38   : > { %v1555_v48 = vrot.slane %v1548_v38, %v4589_v5  ;;  %v1689_v49 = vsel %vm376_vm1, %v1685_v25, %v1688_v44  ;;  %v1761_v50 = vsel %vm376_vm1, %v1760_v39, %v1759_v45  ;;  %v4687_v51 = vrot.slane %v704_v40, %v4589_v5  ;;  %v4145_v45 = vld.sshfl [vmem:[%s4586_s28 + $0x8] sm:$0x20 pattern:$0x76325410] }
  0x39   : > { %1627 = vrot.lane.b32.xlu1 %v1626_v43, %s4503_s15  ;;  %v1690_v53 = vpack.c.b16 %v1689_v49, %v1689_v49  ;;  %v1762_v54 = vpack.c.b16 %v1761_v50, %v1761_v50  ;;  %v4691_v55 = vrot.slane %v712_v41, %v4589_v5  ;;  %v734_v56 = vunpack.c.l.b16 %v4680_v46  ;;  %v4146_v50 = vld.sshfl [vmem:[%s4586_s28 + $0x14] sm:$0x20 pattern:$0x76325410] }
  0x3a   : > { %1556 = vrot.lane.b32.xlu0 %v1555_v48, %s4504_s16  ;;  %v735_v58 = vunpack.c.l.b16 %v4687_v51  ;;  %v354_v59 = vrot.slane %v4079_v36, %v4589_v5  ;;  %v361_v60 = vrot.slane %v4080_v37, %v4589_v5  ;;  %v368_v61 = vrot.slane %v4081_v42, %v4589_v5 }
  0x3b   : > { %v1697_v62 = vrot.slane %v1690_v53, %v4589_v5  ;;  %v1769_v63 = vrot.slane %v1762_v54, %v4589_v5  ;;  %v736_v1 = vunpack.c.l.b16 %v4691_v55  ;;  %v737_v2 = vrot.slane %v734_v56, 1 }
  0x3c   : > { %v369_v4 = vunpack.c.l.b16 %v354_v59  ;;  %v370_v6 = vunpack.c.l.b16 %v361_v60  ;;  %v371_v7 = vunpack.c.l.b16 %v368_v61  ;;  %v1797_v8 = vcombine.high %v4139_v47, %v4139_v47  ;;  %v4147_v59 = vld.sshfl [vmem:[%s4586_s28 + $0x20] sm:$0x20 pattern:$0x76325410]  ;;  %s4512_s28 = smov 92  }
  0x3d   : > { %1770 = vrot.lane.b32.xlu1 %v1769_v63, %s4505_s17  ;;  %v738_v9 = vsel %vm373_vm0, %v735_v58, %v737_v2  ;;  %v739_v10 = vrot.slane %v736_v1, 7  ;;  %v1805_v11 = vcombine.high %v4140_v52, %v4140_v52  ;;  %v1813_v12 = vcombine.high %v4141_v57, %v4141_v57 }
  0x3e   : > { %1698 = vrot.lane.b32.xlu0 %v1697_v62, %s4506_s18  ;;  %v372_v13 = vrot.slane %v370_v6, 7  ;;  %v375_v14 = vrot.slane %v371_v7, 6  ;;  %v446_v15 = vrot.slane %v369_v4, 1  ;;  %v448_v16 = vrot.slane %v371_v7, 7 }
  0x3f   : > { %v740_v18 = vsel %vm376_vm1, %v739_v10, %v738_v9  ;;  %v1820_v19 = vrot.slane %v1797_v8, %v4589_v5  ;;  %v1827_v20 = vrot.slane %v1805_v11, %v4589_v5  ;;  %v1834_v21 = vrot.slane %v1813_v12, %v4589_v5 }
  0x40   : > { %v741_v23 = vpack.c.b16 %v740_v18, %v740_v18  ;;  %v374_v24 = vsel %vm373_vm0, %v372_v13, %v369_v4  ;;  %v447_v25 = vsel %vm373_vm0, %v370_v6, %v446_v15  ;;  %v499_v38 = vrot.slane %v4085_v17, %v4589_v5 }
  0x41   : > { %v377_v29 = vsel %vm376_vm1, %v375_v14, %v374_v24  ;;  %v449_v30 = vsel %vm376_vm1, %v448_v16, %v447_v25  ;;  %v1835_v31 = vunpack.c.l.b16 %v1820_v19  ;;  %v1836_v32 = vunpack.c.l.b16 %v1827_v20 }
  0x42   : > { %v748_v33 = vrot.slane %v741_v23, %v4589_v5  ;;  %v378_v34 = vpack.c.b16 %v377_v29, %v377_v29  ;;  %v450_v35 = vpack.c.b16 %v449_v30, %v449_v30  ;;  %v1837_v36 = vunpack.c.l.b16 %v1834_v21 }
  0x43   : > { %v1838_v37 = vrot.slane %v1836_v32, 7  ;;  %v506_v39 = vrot.slane %v4086_v22, %v4589_v5  ;;  %v513_v40 = vrot.slane %v4087_v26, %v4589_v5  ;;  %v514_v48 = vunpack.c.l.b16 %v499_v38 }
  0x44   : > { %v753_v41 = vsel %vm4720_vm4, %v748_v33, %v752_v28  ;;  %v385_v42 = vrot.slane %v378_v34, %v4589_v5  ;;  %v457_v43 = vrot.slane %v450_v35, %v4589_v5  ;;  %v1840_v44 = vrot.slane %v1837_v36, 6 }
  0x45   : > { %754 = vst [vmem:[#allocation2 + $0x2] sm:$0x3] %v753_v41  ;;  %v1839_v47 = vsel %vm373_vm0, %v1838_v37, %v1835_v31  ;;  %v515_v49 = vunpack.c.l.b16 %v506_v39  ;;  %v516_v53 = vunpack.c.l.b16 %v513_v40  ;;  %v1912_v54 = vrot.slane %v1835_v31, 1  ;;  %v286_v41 = vld [vmem:[#allocation2] sm:$0x3] }
  0x46   : > { %386 = vrot.lane.b32.xlu0 %v385_v42, %s4507_s19  ;;  %458 = vrot.lane.b32.xlu1 %v457_v43, %s4508_s20  ;;  %v1841_v52 = vsel %vm376_vm1, %v1840_v44, %v1839_v47  ;;  %v1914_v57 = vrot.slane %v1837_v36, 7  ;;  %v517_v61 = vrot.slane %v514_v48, 2  ;;  %v588_v63 = vrot.slane %v514_v48, 3  ;;  %s4078_s19 = sshll.u32 %s5155_s21, 1 }
  0x47   : > { %v1842_v60 = vpack.c.b16 %v1841_v52, %v1841_v52  ;;  %v518_v62 = vrot.slane %v515_v49, 1  ;;  %v1913_v2 = vsel %vm373_vm0, %v1836_v32, %v1912_v54  ;;  %v589_v4 = vrot.slane %v515_v49, 2 }
  0x48   : > { %v591_v6 = vrot.slane %v516_v53, 1  ;;  %v1945_v7 = vcombine.high %v4145_v45, %v4145_v45  ;;  %v1915_v10 = vsel %vm376_vm1, %v1914_v57, %v1913_v2  ;;  %v1953_v11 = vcombine.high %v4146_v50, %v4146_v50 }
  0x49   : > { %v1849_v8 = vrot.slane %v1842_v60, %v4589_v5  ;;  %v519_v9 = vsel %vm373_vm0, %v518_v62, %v517_v61  ;;  %v1916_v13 = vpack.c.b16 %v1915_v10, %v1915_v10  ;;  %v590_v14 = vsel %vm373_vm0, %v589_v4, %v588_v63 }
  0x4a   : > { %v520_v12 = vsel %vm376_vm1, %v516_v53, %v519_v9  ;;  %v1961_v15 = vcombine.high %v4147_v59, %v4147_v59  ;;  %v592_v17 = vsel %vm376_vm1, %v591_v6, %v590_v14  ;;  %v1968_v18 = vrot.slane %v1945_v7, %v4589_v5 }
  0x4b   : > { %1850 = vrot.lane.b32.xlu0 %v1849_v8, %s4509_s25  ;;  %v521_v16 = vpack.c.b16 %v520_v12, %v520_v12  ;;  %v1975_v19 = vrot.slane %v1953_v11, %v4589_v5  ;;  %v1923_v20 = vrot.slane %v1916_v13, %v4589_v5  ;;  %v593_v21 = vpack.c.b16 %v592_v17, %v592_v17 }
  0x4c   : > { %v1982_v22 = vrot.slane %v1961_v15, %v4589_v5  ;;  %v1983_v24 = vunpack.c.l.b16 %v1968_v18  ;;  %v663_v26 = vrot.slane %v735_v58, 7  ;;  %v665_v29 = vrot.slane %v736_v1, 6  ;;  %v826_v43 = vld [vmem:[#allocation2 + $0x2] sm:$0x3] }
  0x4d   : > { %v528_v23 = vrot.slane %v521_v16, %v4589_v5  ;;  %v1984_v25 = vunpack.c.l.b16 %v1975_v19  ;;  %v600_v27 = vrot.slane %v593_v21, %v4589_v5  ;;  %v287_v42 = vsel %vm285_vm6, 0, %v286_v41 }
  0x4e   : > { %v1985_v28 = vunpack.c.l.b16 %v1982_v22  ;;  %v1986_v30 = vrot.slane %v1983_v24, 2  ;;  %v664_v32 = vsel %vm373_vm0, %v663_v26, %v734_v56  ;;  %v2060_v33 = vrot.slane %v1983_v24, 3  ;;  %288 = vst [vmem:[#allocation2] sm:$0x3] %v287_v42 }
  0x4f   : > { %529 = vrot.lane.b32.xlu1 %v528_v23, %s4510_s26  ;;  %1924 = vrot.lane.b32.xlu0 %v1923_v20, %s4511_s27  ;;  %v1987_v31 = vrot.slane %v1984_v25, 1  ;;  %v666_v51 = vsel %vm376_vm1, %v665_v29, %v664_v32  ;;  %v2061_v58 = vrot.slane %v1984_v25, 2  ;;  %vm1184_vm4 = vcmask 1025888  }
  0x50   : > { %v2063_v34 = vrot.slane %v1985_v28, 1  ;;  %v667_v36 = vpack.c.b16 %v666_v51, %v666_v51  ;;  %vm1185_vm6 = vmand %vm1184_vm4, %vm284_vm2 }
  0x51   : > { %v1988_v35 = vsel %vm373_vm0, %v1987_v31, %v1986_v30  ;;  %v2062_v1 = vsel %vm373_vm0, %v2061_v58, %v2060_v33  ;;  %vm389_vm0 = vcmask 451888  }
  0x52   : > { %v1989_v55 = vsel %vm376_vm1, %v1985_v28, %v1988_v35  ;;  %v674_v46 = vrot.slane %v667_v36, %v4589_v5  ;;  %v2064_v56 = vsel %vm376_vm1, %v2063_v34, %v2062_v1  ;;  %vm1113_vm1 = vmand %vm1112_vm15, %vm284_vm2 }
  0x53   : > { %601 = vrot.lane.b32.xlu1 %v600_v27, %s4512_s28  ;;  %v1990_v37 = vpack.c.b16 %v1989_v55, %v1989_v55  ;;  %v2065_v38 = vpack.c.b16 %v2064_v56, %v2064_v56  ;;  %vm391_vm3 = vmand %vm389_vm0, %vm284_vm2 }
  0x54   : > { %vm533_vm0 = vmand %vm532_vm13, %vm284_vm2  ;;  %vm1559_vm13 = vcmask 714288  }
  0x55   : > { %v1997_v39 = vrot.slane %v1990_v37, %v4589_v5  ;;  %v2072_v40 = vrot.slane %v2065_v38, %v4589_v5  ;;  %v392_v8 = vld [vmem:[#allocation2] sm:$0x3] }
  0x57   : > { %1998 = vrot.lane.b32.xlu0 %v1997_v39, %s4513_s29  ;;  %675 = vrot.lane.b32.xlu1 %v674_v46, %s4514_s30 }
  0x5b   : > { %2073 = vrot.lane.b32.xlu0 %v2072_v40, %s4515_s7 }
  0x94   : > { %v822_v44 = vpop.permute.xlu0 %821 }
  0x95   : > { %v827_v45 = vsel %vm825_vm8, %v822_v44, %v826_v43  ;;  %v968_v50 = vpop.permute.xlu1 %967  ;;  %vm1261_vm8 = vcmask 1042416  }
  0x96   : > { %828 = vst [vmem:[#allocation2 + $0x2] sm:$0x3] %v827_v45  ;;  %vm1262_vm11 = vmand %vm1261_vm8, %vm284_vm2 }
  0x98   : > { %v897_v47 = vpop.permute.xlu0 %896 }
  0x99   : > { %v1039_v57 = vpop.permute.xlu1 %1038 }
  0x9c   : > { %v1110_v52 = vpop.permute.xlu0 %1109 }
  0x9d   : > { %v901_v48 = vld [vmem:[#allocation2 + $0x2] sm:$0x3]  ;;  %v1182_v60 = vpop.permute.xlu1 %1181 }
  0x9e   : > { %v902_v49 = vsel %vm900_vm10, %v897_v47, %v901_v48  ;;  %vm1264_vm10 = vsmask.f32 3328 }
  0x9f   : > { %903 = vst [vmem:[#allocation2 + $0x2] sm:$0x3] %v902_v49 }
  0xa2   : > { %v1337_v63 = vpop.permute.xlu1 %1336 }
  0xa3   : > { %v1256_v59 = vpop.permute.xlu0 %1255 }
  0xa4   : > { %v1257_v20 = vrot.slane %v1256_v59, 6 }
  0xa6   : > { %v972_v53 = vld [vmem:[#allocation2 + $0x2] sm:$0x3]  ;;  %v4778_v6 = vpop.permute.xlu1 %1485 }
  0xa7   : > { %v973_v54 = vsel %vm971_vm12, %v968_v50, %v972_v53  ;;  %v4773_v61 = vpop.permute.xlu0 %1410  ;;  %vm1265_vm12 = vmand %vm1263_vm9, %vm1264_vm10 }
  0xa8   : > { %974 = vst [vmem:[#allocation2 + $0x2] sm:$0x3] %v973_v54  ;;  %vm1266_vm15 = vmor %vm1265_vm12, %vm1262_vm11  ;;  %vm1488_vm11 = vcmask 566688  }
  0xa9   : > { %vm1489_vm12 = vmand %vm1488_vm11, %vm284_vm2 }
  0xab   : > { %v4784_v9 = vpop.permute.xlu1 %1627 }
  0xac   : > { %v4776_v4 = vpop.permute.xlu0 %1556 }
  0xaf   : > { %v1043_v62 = vld [vmem:[#allocation2 + $0x2] sm:$0x3]  ;;  %v4786_v14 = vpop.permute.xlu1 %1770 }
  0xb0   : > { %v1044_v2 = vsel %vm1042_vm14, %v1039_v57, %v1043_v62  ;;  %v4780_v7 = vpop.permute.xlu0 %1698  ;;  %vm1258_vm14 = vcmask 1031168   ;;  %v1772_v39 = vrot.slane %v4786_v14, 6 }
  0xb1   : > { %1045 = vst [vmem:[#allocation2 + $0x2] sm:$0x3] %v1044_v2  ;;  %v1259_v22 = vsel %vm1258_vm14, %v1257_v20, %v1256_v59 }
  0xb8   : > { %v1114_v10 = vld [vmem:[#allocation2 + $0x2] sm:$0x3]  ;;  %v387_v11 = vpop.permute.xlu0 %386  ;;  %v459_v15 = vpop.permute.xlu1 %458 }
  0xb9   : > { %v1115_v12 = vsel %vm1113_vm1, %v1110_v52, %v1114_v10  ;;  %v393_v13 = vsel %vm391_vm3, %v387_v11, %v392_v8  ;;  %vm1339_vm1 = vcmask 271488   ;;  %vm604_vm3 = vcmask 894688  }
  0xba   : > { %1116 = vst [vmem:[#allocation2 + $0x2] sm:$0x3] %v1115_v12  ;;  %394 = vst [vmem:[#allocation2] sm:$0x3] %v393_v13 }
  0xbb   : > { %vm1340_vm4 = vmand %vm1339_vm1, %vm284_vm2 }
  0xbc   : > { %vm605_vm5 = vmand %vm604_vm3, %vm284_vm2  ;;  %vm1701_vm3 = vcmask 1009488  }
  0xbd   : > { %v1851_v43 = vpop.permute.xlu0 %1850 }
  0xc1   : > { %v1186_v16 = vld [vmem:[#allocation2 + $0x2] sm:$0x3]  ;;  %v463_v17 = vld [vmem:[#allocation2] sm:$0x3]  ;;  %v530_v21 = vpop.permute.xlu1 %529  ;;  %v1925_v47 = vpop.permute.xlu0 %1924 }
  0xc2   : > { %v1187_v18 = vsel %vm1185_vm6, %v1182_v60, %v1186_v16  ;;  %v464_v19 = vsel %vm462_vm7, %v459_v15, %v463_v17  ;;  %vm1413_vm6 = vcmask 419088   ;;  %vm678_vm7 = vcmask 1042288  }
  0xc3   : > { %1188 = vst [vmem:[#allocation2 + $0x2] sm:$0x3] %v1187_v18  ;;  %465 = vst [vmem:[#allocation2] sm:$0x3] %v464_v19 }
  0xc4   : > { %vm1414_vm8 = vmand %vm1413_vm6, %vm284_vm2  ;;  %vm1778_vm6 = vcmask 109570  }
  0xc5   : > { %v602_v27 = vpop.permute.xlu1 %601  ;;  %vm679_vm9 = vmand %vm678_vm7, %vm284_vm2 }
  0xc9   : > { %v676_v32 = vpop.permute.xlu1 %675  ;;  %v1999_v50 = vpop.permute.xlu0 %1998 }
  0xca   : > { %v1267_v23 = vld [vmem:[#allocation2 + $0x2] sm:$0xf]  ;;  %v534_v24 = vld [vmem:[#allocation2] sm:$0x3] }
  0xcb   : > { %v1268_v25 = vsel %vm1266_vm15, %v1259_v22, %v1267_v23  ;;  %v535_v26 = vsel %vm533_vm0, %v530_v21, %v534_v24  ;;  %vm1560_vm15 = vmand %vm1559_vm13, %vm284_vm2  ;;  %vm1630_vm0 = vcmask 861888   ;;  %v4450_v22 = vld [vmem:[%s5143_s2 + $0x10] sm:$0xff]  }
  0xcc   : > { %1269 = vst [vmem:[#allocation2 + $0x2] sm:$0xf] %v1268_v25  ;;  %536 = vst [vmem:[#allocation2] sm:$0x3] %v535_v26 }
  0xcd   : > { %vm1631_vm1 = vmand %vm1630_vm0, %vm284_vm2  ;;  %v2074_v54 = vpop.permute.xlu0 %2073 }
  0xd3   : > { %v1341_v28 = vld [vmem:[#allocation2 + $0x4] sm:$0x3]  ;;  %v606_v29 = vld [vmem:[#allocation2] sm:$0x3] }
  0xd4   : > { %v1342_v30 = vsel %vm1340_vm4, %v1337_v63, %v1341_v28  ;;  %v607_v31 = vsel %vm605_vm5, %v602_v27, %v606_v29  ;;  %vm1702_vm4 = vmand %vm1701_vm3, %vm284_vm2  ;;  %vm1776_vm5 = vcmask 1042400   ;;  %vm2076_vm3 = vcmask 697888  }
  0xd5   : > { %1343 = vst [vmem:[#allocation2 + $0x4] sm:$0x3] %v1342_v30  ;;  %608 = vst [vmem:[#allocation2] sm:$0x3] %v607_v31  ;;  %v4516_v63 = vmov 0  }
  0xd6   : > { %vm1777_vm7 = vmand %vm1776_vm5, %vm284_vm2  ;;  %2186 = vmatprep.mubr.bf16.mxu0 %v4516_v63  ;;  %2239 = vmatprep.mubr.bf16.mxu1 %v4516_v63  ;;  %vm2127_vm5 = vcmask 1039360  }
  0xd7   : > { %4447 = vset.pattern.permute.xlu1 %v4516_v63  ;;  %4448 = vset.pattern.permute.xlu0 %v4516_v63 }
  0xdc   : > { %v1415_v33 = vld [vmem:[#allocation2 + $0x4] sm:$0x3]  ;;  %v680_v51 = vld [vmem:[#allocation2] sm:$0x3] }
  0xdd   : > { %v1416_v58 = vsel %vm1414_vm8, %v4773_v61, %v1415_v33  ;;  %v681_v34 = vsel %vm679_vm9, %v676_v32, %v680_v51  ;;  %vm1779_vm8 = vmand %vm1778_vm6, %vm1264_vm10  ;;  %vm1773_vm9 = vcmask 1014784   ;;  %vm2001_vm10 = vcmask 550288   ;;  %v4451_v32 = vld [vmem:[%s5143_s2 + $0x18] sm:$0xff]   ;;  %v3695_v51 = vld [vmem:[%s5144_s3] sm:$0xff] }
  0xde   : > { %1417 = vst [vmem:[#allocation2 + $0x4] sm:$0x3] %v1416_v58  ;;  %682 = vst [vmem:[#allocation2] sm:$0x3] %v681_v34  ;;  %v1774_v40 = vsel %vm1773_vm9, %v1772_v39, %v4786_v14  ;;  %vm2139_vm6 = vcmask 1041408   ;;  %v3696_v58 = vld [vmem:[%s5144_s3 + $0x8] sm:$0xff] }
  0xdf   : > { %vm1780_vm11 = vmor %vm1779_vm8, %vm1777_vm7  ;;  %vm2131_vm7 = vcmask 23552   ;;  %vm2621_vm8 = vcmask 900096   ;;  %vm2993_vm9 = vcmask 883712  }
  0xe5   : > { %v1490_v35 = vld [vmem:[#allocation2 + $0x4] sm:$0x3] }
  0xe6   : > { %v1491_v36 = vsel %vm1489_vm12, %v4778_v6, %v1490_v35  ;;  %vm1853_vm12 = vcmask 255088   ;;  %v3697_v35 = vld [vmem:[%s5144_s3 + $0x10] sm:$0xff] }
  0xe7   : > { %1492 = vst [vmem:[#allocation2 + $0x4] sm:$0x3] %v1491_v36  ;;  %vm1854_vm13 = vmand %vm1853_vm12, %vm284_vm2  ;;  %vm3365_vm12 = vcmask 744448  }
  0xee   : > { %v1561_v55 = vld [vmem:[#allocation2 + $0x4] sm:$0x3] }
  0xef   : > { %v1562_v1 = vsel %vm1560_vm15, %v4776_v4, %v1561_v55  ;;  %vm1927_vm15 = vcmask 402688  }
  0xf0   : > { %1563 = vst [vmem:[#allocation2 + $0x4] sm:$0x3] %v1562_v1  ;;  %vm1928_vm0 = vmand %vm1927_vm15, %vm284_vm2  ;;  %v4452_v1 = vld [vmem:[%s5143_s2] sm:$0xff]   ;;  %vm292_vm15 = vcmask 392192  }
  0xf7   : > { %v1632_v37 = vld [vmem:[#allocation2 + $0x4] sm:$0x3] }
  0xf8   : > { %v1633_v46 = vsel %vm1631_vm1, %v4784_v9, %v1632_v37  ;;  %vm2002_vm1 = vmand %vm2001_vm10, %vm284_vm2 }
  0xf9   : > { %1634 = vst [vmem:[#allocation2 + $0x4] sm:$0x3] %v1633_v46 }
 0x100   : > { %v1703_v56 = vld [vmem:[#allocation2 + $0x4] sm:$0x3] }
 0x101   : > { %v1704_v38 = vsel %vm1702_vm4, %v4780_v7, %v1703_v56  ;;  %vm2077_vm4 = vmand %vm2076_vm3, %vm284_vm2  ;;  %vm2138_vm2 = vcmask 1040384   ;;  %vm3929_vm3 = vcmask 261120  }
 0x102   : > { %1705 = vst [vmem:[#allocation2 + $0x4] sm:$0x3] %v1704_v38 }
 0x109   : > { %v1781_v41 = vld [vmem:[#allocation2 + $0x4] sm:$0xf] }
 0x10a   : > { %v1782_v42 = vsel %vm1780_vm11, %v1774_v40, %v1781_v41  ;;  %v3698_v41 = vld [vmem:[%s5144_s3 + $0x18] sm:$0xff]  ;;  %vm3179_vm11 = vcmask 752640  }
 0x10b   : > { %1783 = vst [vmem:[#allocation2 + $0x4] sm:$0xf] %v1782_v42 }
 0x112   : > { %v1855_v44 = vld [vmem:[#allocation2 + $0x6] sm:$0x3] }
 0x113   : > { %v1856_v45 = vsel %vm1854_vm13, %v1851_v43, %v1855_v44  ;;  %v4453_v43 = vld [vmem:[%s5143_s2 + $0x8] sm:$0xff]   ;;  %vm3551_vm13 = vcmask 736256  }
 0x114   : > { %1857 = vst [vmem:[#allocation2 + $0x6] sm:$0x3] %v1856_v45 }
 0x11b   : > { %v1929_v48 = vld [vmem:[#allocation2 + $0x6] sm:$0x3] }
 0x11c   : > { %v1930_v49 = vsel %vm1928_vm0, %v1925_v47, %v1929_v48 }
 0x11d   : > { %1931 = vst [vmem:[#allocation2 + $0x6] sm:$0x3] %v1930_v49  ;;  %v4454_v49 = vld [vmem:[%s5143_s2 + $0x20] sm:$0xff]  }
 0x124   : > { %v2003_v52 = vld [vmem:[#allocation2 + $0x6] sm:$0x3] }
 0x125   : > { %v2004_v53 = vsel %vm2002_vm1, %v1999_v50, %v2003_v52  ;;  %vm4523_vm1 = vmmov 0  }
 0x126   : > { %2005 = vst [vmem:[#allocation2 + $0x6] sm:$0x3] %v2004_v53 }
 0x12d   : > { %v2078_v57 = vld [vmem:[#allocation2 + $0x6] sm:$0x3] }
 0x12e   : > { %v2079_v59 = vsel %vm2077_vm4, %v2074_v54, %v2078_v57  ;;  %vm4003_vm4 = vcmask 1024  }
 0x12f   : > { %2080 = vst [vmem:[#allocation2 + $0x6] sm:$0x3] %v2079_v59 }
 0x136   : > { %v2081_v60 = vld [vmem:[#allocation2] sm:$0xff] }
 0x137   : > { %v4816_v61 = vrot.slane %v2081_v60, %v4589_v5  ;;  %v2102_v62 = vcombine.high %v2081_v60, %v2081_v60 }
 0x139   : > { %v4824_v2 = vcombine.high %v4816_v61, %v4816_v61  ;;  %v4827_v4 = vrot.slane %v2102_v62, %v4589_v5  ;;  %v4520_v5 = vmov 65535  }
 0x13a   : > { %v2140_v7 = vsel %vm2138_vm2, 4294967295, %v4520_v5  ;;  %v4456_v5 = vld [vmem:[%s5143_s2 + $0x30] sm:$0xff]  }
 0x13b   : > { %2121 = vrot.lane.b32.xlu1 %v4824_v2, %s4517_s8  ;;  %2123 = vrot.lane.b32.xlu0 %v4827_v4, %s4517_s8  ;;  %v2118_v6 = vcombine.high %v4827_v4, %v4827_v4  ;;  %v4875_v11 = vsel %vm2139_vm6, %v2140_v7, 0 }
 0x13c   : > { %v2280_v20 = vand.u32 %v4875_v11, %v4824_v2  ;;  %v2277_v27 = vand.u32 %v4875_v11, %v4816_v61  ;;  %v2283_v28 = vand.u32 %v4875_v11, %v4827_v4 }
 0x13d   : > { %v2286_v21 = vand.u32 %v4875_v11, %v2118_v6 }
 0x13f   : > { %2119 = vrot.lane.b32.xlu1 %v4816_v61, %s4517_s8  ;;  %2125 = vrot.lane.b32.xlu0 %v2118_v6, %s4517_s8 }
 0x143   : > { %2430 = vrot.lane.b32.xlu1 %v4824_v2, %s4500_s12  ;;  %2432 = vrot.lane.b32.xlu0 %v4827_v4, %s4500_s12 }
 0x147   : > { %2428 = vrot.lane.b32.xlu1 %v4816_v61, %s4500_s12  ;;  %2434 = vrot.lane.b32.xlu0 %v2118_v6, %s4500_s12  ;;  %s4519_s12 = smov 91  }
 0x14b   : > { %2615 = vrot.lane.b32.xlu1 %v4824_v2, %s4514_s30  ;;  %2617 = vrot.lane.b32.xlu0 %v4827_v4, %s4514_s30 }
 0x14f   : > { %2613 = vrot.lane.b32.xlu1 %v4816_v61, %s4514_s30  ;;  %2619 = vrot.lane.b32.xlu0 %v2118_v6, %s4514_s30 }
 0x153   : > { %2801 = vrot.lane.b32.xlu1 %v4824_v2, %s4518_s11  ;;  %2803 = vrot.lane.b32.xlu0 %v4827_v4, %s4518_s11 }
 0x157   : > { %2799 = vrot.lane.b32.xlu1 %v4816_v61, %s4518_s11  ;;  %2805 = vrot.lane.b32.xlu0 %v2118_v6, %s4518_s11 }
 0x15b   : > { %2987 = vrot.lane.b32.xlu1 %v4824_v2, %s4498_s10  ;;  %2989 = vrot.lane.b32.xlu0 %v4827_v4, %s4498_s10 }
 0x15f   : > { %2985 = vrot.lane.b32.xlu1 %v4816_v61, %s4498_s10  ;;  %2991 = vrot.lane.b32.xlu0 %v2118_v6, %s4498_s10 }
 0x163   : > { %3173 = vrot.lane.b32.xlu1 %v4824_v2, %s4512_s28  ;;  %3175 = vrot.lane.b32.xlu0 %v4827_v4, %s4512_s28 }
 0x167   : > { %3171 = vrot.lane.b32.xlu1 %v4816_v61, %s4512_s28  ;;  %3177 = vrot.lane.b32.xlu0 %v2118_v6, %s4512_s28  ;;  %s277_s28 = scalar_lea.vmem %s5147_s6, %s4078_s19 }
 0x16b   : > { %3359 = vrot.lane.b32.xlu1 %v4824_v2, %s4519_s12  ;;  %3361 = vrot.lane.b32.xlu0 %v4827_v4, %s4519_s12 }
 0x16f   : > { %3357 = vrot.lane.b32.xlu1 %v4816_v61, %s4519_s12  ;;  %3363 = vrot.lane.b32.xlu0 %v2118_v6, %s4519_s12 }
 0x173   : > { %3545 = vrot.lane.b32.xlu1 %v4824_v2, %s4497_s9  ;;  %3547 = vrot.lane.b32.xlu0 %v4827_v4, %s4497_s9 }
 0x177   : > { %3543 = vrot.lane.b32.xlu1 %v4816_v61, %s4497_s9  ;;  %3549 = vrot.lane.b32.xlu0 %v2118_v6, %s4497_s9  ;;  %v4455_v61 = vld [vmem:[%s5143_s2 + $0x28] sm:$0xff]  }
 0x17b   : > { %3701 = vperm.xlu1 %4447, %v3695_v51   ;;  %3706 = vperm.xlu0 %4448, %v3696_v58  }
 0x17f   : > { %3711 = vperm.xlu1 %4447, %v3697_v35  }
 0x183   : > { %3716 = vperm.xlu1 %4447, %v3698_v41  }
 0x1ad   : > { %v2122_v8 = vpop.permute.xlu1 %2121  ;;  %v2124_v9 = vpop.permute.xlu0 %2123 }
 0x1ae   : > { %v2129_v10 = vsel %vm2127_vm5, %v2122_v8, %v2124_v9 }
 0x1af   : > { %v2146_v12 = vand.u32 %v4875_v11, %v2129_v10 }
 0x1b1   : > { %v2120_v13 = vpop.permute.xlu1 %2119  ;;  %2154 = vmatprep.subr.bf16.mxu0 %v2146_v12  ;;  %v2126_v14 = vpop.permute.xlu0 %2125 }
 0x1b2   : > { %v2128_v15 = vsel %vm2127_vm5, %v2120_v13, %v2122_v8  ;;  %v2130_v16 = vsel %vm2127_vm5, %v2124_v9, %v2126_v14  ;;  %v2152_v17 = vand.u32 %v4875_v11, %v2126_v14 }
 0x1b3   : > { %v2143_v18 = vand.u32 %v4875_v11, %v2128_v15  ;;  %v2149_v19 = vand.u32 %v4875_v11, %v2130_v16  ;;  %v4457_v15 = vld [vmem:[%s5143_s2 + $0x38] sm:$0xff]  }
 0x1b4   : > { %2207 = vmatprep.subr.bf16.mxu1 %v2152_v17 }
 0x1b5   : > { %v2431_v23 = vpop.permute.xlu1 %2430  ;;  %2155 = vmatpush1.bf16.msra.mxu0 %v2143_v18  ;;  %2208 = vmatpush1.bf16.msra.mxu1 %v2149_v19  ;;  %v2433_v24 = vpop.permute.xlu0 %2432 }
 0x1b6   : > { %v2437_v25 = vsel %vm1258_vm14, %v2431_v23, %v2433_v24  ;;  %2288 = vmatprep.subr.bf16.mxu0 %v2280_v20  ;;  %2341 = vmatprep.subr.bf16.mxu1 %v2286_v21  ;;  %v4458_v20 = vld [vmem:[%s5143_s2 + $0x40] sm:$0xff]  }
 0x1b7   : > { %v2449_v26 = vand.u32 %v2437_v25, %v4875_v11 }
 0x1b8   : > { %4157 = vmatmul.mubr.msk.bf16.vlgmr.msra.gmra.mrb[0].mxu0 %vm2131_vm7, %v4450_v22  ;;  %4159 = vmatmul.mubr.msk.bf16.vlgmr.msra.gmra.mrb[0].mxu1 %vm2131_vm7, %v4450_v22 }
 0x1b9   : > { %2289 = vmatpush1.bf16.msra.mxu0 %v2277_v27  ;;  %v2435_v29 = vpop.permute.xlu0 %2434  ;;  %2342 = vmatpush1.bf16.msra.mxu1 %v2283_v28  ;;  %v2429_v31 = vpop.permute.xlu1 %2428  ;;  %v4459_v28 = vld [vmem:[%s5143_s2 + $0x48] sm:$0xff]  }
 0x1ba   : > { %v2455_v30 = vand.u32 %v2435_v29, %v4875_v11  ;;  %2457 = vmatprep.subr.bf16.mxu0 %v2449_v26  ;;  %2196 = vmatprep.mubr.bf16.mxu0 %v4516_v63  ;;  %v2436_v36 = vsel %vm1258_vm14, %v2429_v31, %v2431_v23  ;;  %v2438_v55 = vsel %vm1258_vm14, %v2433_v24, %v2435_v29  ;;  %vm2807_vm14 = vcmask 891904  }
 0x1bb   : > { %2249 = vmatprep.mubr.bf16.mxu1 %v4516_v63  ;;  %v2446_v56 = vand.u32 %v2436_v36, %v4875_v11  ;;  %v2452_v38 = vand.u32 %v2438_v55, %v4875_v11 }
 0x1bc   : > { %2510 = vmatprep.subr.bf16.mxu1 %v2455_v30 }
 0x1bd   : > { %v2618_v33 = vpop.permute.xlu0 %2617  ;;  %v2616_v34 = vpop.permute.xlu1 %2615 }
 0x1be   : > { %v2623_v37 = vsel %vm2621_vm8, %v2616_v34, %v2618_v33 }
 0x1bf   : > { %v2635_v39 = vand.u32 %v2623_v37, %v4875_v11  ;;  %v4461_v37 = vld [vmem:[%s5143_s2 + $0x58] sm:$0xff]  }
 0x1c0   : > { %4158 = vmatmul.mubr.msk.bf16.gmra.mrb[4].mxu0 %vm2131_vm7, %v4451_v32  ;;  %4160 = vmatmul.mubr.msk.bf16.gmra.mrb[4].mxu1 %vm2131_vm7, %v4451_v32 }
 0x1c1   : > { %2320 = vmatprep.mubr.bf16.mxu0 %v4516_v63  ;;  %2373 = vmatprep.mubr.bf16.mxu1 %v4516_v63  ;;  %v2620_v46 = vpop.permute.xlu0 %2619  ;;  %v2614_v42 = vpop.permute.xlu1 %2613 }
 0x1c2   : > { %v2641_v40 = vand.u32 %v2620_v46, %v4875_v11  ;;  %v2622_v47 = vsel %vm2621_vm8, %v2614_v42, %v2616_v34  ;;  %v2624_v48 = vsel %vm2621_vm8, %v2618_v33, %v2620_v46  ;;  %v4460_v33 = vld [vmem:[%s5143_s2 + $0x50] sm:$0xff]  }
 0x1c3   : > { %v2632_v53 = vand.u32 %v2622_v47, %v4875_v11  ;;  %v2638_v54 = vand.u32 %v2624_v48, %v4875_v11  ;;  %v4463_v48 = vld [vmem:[%s5143_s2 + $0x68] sm:$0xff]  }
 0x1c5   : > { %v2804_v44 = vpop.permute.xlu0 %2803  ;;  %v2802_v45 = vpop.permute.xlu1 %2801 }
 0x1c6   : > { %v2809_v50 = vsel %vm2807_vm14, %v2802_v45, %v2804_v44 }
 0x1c7   : > { %v2821_v57 = vand.u32 %v2809_v50, %v4875_v11 }
 0x1c8   : > { %4163 = vmatmul.mubr.msk.bf16.vlgmr.msra.gmra.mrb[0].mxu0 %vm2131_vm7, %v4452_v1  ;;  %4165 = vmatmul.mubr.msk.bf16.vlgmr.msra.gmra.mrb[0].mxu1 %vm2131_vm7, %v4452_v1 }
 0x1c9   : > { %2458 = vmatpush1.bf16.msra.mxu0 %v2446_v56  ;;  %2511 = vmatpush1.bf16.msra.mxu1 %v2452_v38  ;;  %v2806_v52 = vpop.permute.xlu0 %2805  ;;  %v2800_v60 = vpop.permute.xlu1 %2799 }
 0x1ca   : > { %2643 = vmatprep.subr.bf16.mxu0 %v2635_v39  ;;  %2696 = vmatprep.subr.bf16.mxu1 %v2641_v40  ;;  %v2827_v59 = vand.u32 %v2806_v52, %v4875_v11  ;;  %v2808_v4 = vsel %vm2807_vm14, %v2800_v60, %v2802_v45  ;;  %v2810_v6 = vsel %vm2807_vm14, %v2804_v44, %v2806_v52  ;;  %v4462_v40 = vld [vmem:[%s5143_s2 + $0x60] sm:$0xff]   ;;  %v4467_v60 = vld [vmem:[%s5143_s2 + $0x88] sm:$0xff]  }
 0x1cb   : > { %2330 = vmatprep.mubr.bf16.mxu0 %v4516_v63  ;;  %2383 = vmatprep.mubr.bf16.mxu1 %v4516_v63  ;;  %v2818_v9 = vand.u32 %v2808_v4, %v4875_v11  ;;  %v2824_v10 = vand.u32 %v2810_v6, %v4875_v11  ;;  %v3773_v4 = vld [vmem:[%s5142_s1] sm:$0xf] }
 0x1cd   : > { %v2990_v62 = vpop.permute.xlu0 %2989  ;;  %v2988_v2 = vpop.permute.xlu1 %2987 }
 0x1ce   : > { %v2995_v7 = vsel %vm2993_vm9, %v2988_v2, %v2990_v62 }
 0x1cf   : > { %v3007_v12 = vand.u32 %v2995_v7, %v4875_v11 }
 0x1d0   : > { %4164 = vmatmul.mubr.msk.bf16.gmra.mrb[4].mxu0 %vm2131_vm7, %v4453_v43  ;;  %4166 = vmatmul.mubr.msk.bf16.gmra.mrb[4].mxu1 %vm2131_vm7, %v4453_v43 }
 0x1d1   : > { %2489 = vmatprep.mubr.bf16.mxu0 %v4516_v63  ;;  %2542 = vmatprep.mubr.bf16.mxu1 %v4516_v63  ;;  %v2992_v8 = vpop.permute.xlu0 %2991  ;;  %v2986_v14 = vpop.permute.xlu1 %2985 }
 0x1d2   : > { %v3013_v13 = vand.u32 %v2992_v8, %v4875_v11  ;;  %v2994_v18 = vsel %vm2993_vm9, %v2986_v14, %v2988_v2  ;;  %v2996_v19 = vsel %vm2993_vm9, %v2990_v62, %v2992_v8  ;;  %v3777_v62 = vsub.s32 0, %v4580_v3 }
 0x1d3   : > { %v3004_v23 = vand.u32 %v2994_v18, %v4875_v11  ;;  %v3010_v24 = vand.u32 %v2996_v19, %v4875_v11  ;;  %v3785_v2 = vsub.s32 2, %v4580_v3 }
 0x1d4   : > { %v3778_v7 = vrot.slane %v3773_v4, %v3777_v62 }
 0x1d5   : > { %v3176_v16 = vpop.permute.xlu0 %3175  ;;  %v3174_v17 = vpop.permute.xlu1 %3173  ;;  %v3786_v8 = vrot.slane %v3773_v4, %v3785_v2 }
 0x1d6   : > { %v3181_v21 = vsel %vm3179_vm11, %v3174_v17, %v3176_v16 }
 0x1d7   : > { %v3193_v25 = vand.u32 %v3181_v21, %v4875_v11 }
 0x1d8   : > { %4173 = vmatmul.mubr.msk.bf16.vlgmr.msra.gmra.mrb[0].mxu0 %vm2131_vm7, %v4454_v49  ;;  %4175 = vmatmul.mubr.msk.bf16.vlgmr.msra.gmra.mrb[0].mxu1 %vm2131_vm7, %v4454_v49 }
 0x1d9   : > { %2644 = vmatpush1.bf16.msra.mxu0 %v2632_v53  ;;  %2697 = vmatpush1.bf16.msra.mxu1 %v2638_v54  ;;  %v3178_v22 = vpop.permute.xlu0 %3177  ;;  %v3172_v27 = vpop.permute.xlu1 %3171  ;;  %v4464_v53 = vld [vmem:[%s5143_s2 + $0x70] sm:$0xff]  }
 0x1da   : > { %2829 = vmatprep.subr.bf16.mxu0 %v2821_v57  ;;  %2882 = vmatprep.subr.bf16.mxu1 %v2827_v59  ;;  %v3199_v26 = vand.u32 %v3178_v22, %v4875_v11  ;;  %v3180_v31 = vsel %vm3179_vm11, %v3172_v27, %v3174_v17  ;;  %v3182_v32 = vsel %vm3179_vm11, %v3176_v16, %v3178_v22  ;;  %v4465_v59 = vld [vmem:[%s5143_s2 + $0x78] sm:$0xff]  }
 0x1db   : > { %2499 = vmatprep.mubr.bf16.mxu0 %v4516_v63  ;;  %2552 = vmatprep.mubr.bf16.mxu1 %v4516_v63  ;;  %v3190_v34 = vand.u32 %v3180_v31, %v4875_v11  ;;  %v3196_v35 = vand.u32 %v3182_v32, %v4875_v11 }
 0x1dd   : > { %v3362_v29 = vpop.permute.xlu0 %3361  ;;  %v3360_v30 = vpop.permute.xlu1 %3359 }
 0x1de   : > { %v3367_v51 = vsel %vm3365_vm12, %v3360_v30, %v3362_v29 }
 0x1df   : > { %v3379_v36 = vand.u32 %v3367_v51, %v4875_v11 }
 0x1e0   : > { %4174 = vmatmul.mubr.msk.bf16.gmra.mrb[4].mxu0 %vm2131_vm7, %v4455_v61  ;;  %4176 = vmatmul.mubr.msk.bf16.gmra.mrb[4].mxu1 %vm2131_vm7, %v4455_v61  ;;  %v4521_v61 = vmov 0.0  }
 0x1e1   : > { %2675 = vmatprep.mubr.bf16.mxu0 %v4516_v63  ;;  %2728 = vmatprep.mubr.bf16.mxu1 %v4516_v63  ;;  %v3364_v58 = vpop.permute.xlu0 %3363  ;;  %v3358_v1 = vpop.permute.xlu1 %3357  ;;  %293 = vst.msk [vmem:[#allocation3 + $0x18] sm:$0xff] %vm292_vm15, %v4521_v61  ;;  %297 = vst.msk [vmem:[#allocation3 + $0x38] sm:$0xff] %vm292_vm15, %v4521_v61 }
 0x1e2   : > { %v3385_v55 = vand.u32 %v3364_v58, %v4875_v11  ;;  %v3366_v38 = vsel %vm3365_vm12, %v3358_v1, %v3360_v30  ;;  %v3368_v39 = vsel %vm3365_vm12, %v3362_v29, %v3364_v58  ;;  %301 = vst.msk [vmem:[#allocation3 + $0x58] sm:$0xff] %vm292_vm15, %v4521_v61  ;;  %305 = vst.msk [vmem:[#allocation3 + $0x78] sm:$0xff] %vm292_vm15, %v4521_v61 }
 0x1e3   : > { %v3376_v43 = vand.u32 %v3366_v38, %v4875_v11  ;;  %v3382_v44 = vand.u32 %v3368_v39, %v4875_v11 }
 0x1e5   : > { %v3548_v46 = vpop.permute.xlu0 %3547  ;;  %v3546_v56 = vpop.permute.xlu1 %3545 }
 0x1e6   : > { %v3553_v41 = vsel %vm3551_vm13, %v3546_v56, %v3548_v46 }
 0x1e7   : > { %v3565_v45 = vand.u32 %v3553_v41, %v4875_v11 }
 0x1e8   : > { %4183 = vmatmul.mubr.msk.bf16.vlgmr.msra.gmra.mrb[0].mxu0 %vm2131_vm7, %v4456_v5  ;;  %4185 = vmatmul.mubr.msk.bf16.vlgmr.msra.gmra.mrb[0].mxu1 %vm2131_vm7, %v4456_v5  ;;  %v3802_v1 = vld [vmem:[#allocation3 + $0x18] sm:$0xff] }
 0x1e9   : > { %2830 = vmatpush1.bf16.msra.mxu0 %v2818_v9  ;;  %2883 = vmatpush1.bf16.msra.mxu1 %v2824_v10  ;;  %v3550_v42 = vpop.permute.xlu0 %3549  ;;  %v3544_v49 = vpop.permute.xlu1 %3543  ;;  %v3781_v9 = vsub.s32 1, %v4580_v3 }
 0x1ea   : > { %3015 = vmatprep.subr.bf16.mxu0 %v3007_v12  ;;  %3068 = vmatprep.subr.bf16.mxu1 %v3013_v13  ;;  %v3571_v47 = vand.u32 %v3550_v42, %v4875_v11  ;;  %v3552_v50 = vsel %vm3551_vm13, %v3544_v49, %v3546_v56  ;;  %v3554_v52 = vsel %vm3551_vm13, %v3548_v46, %v3550_v42 }
 0x1eb   : > { %2685 = vmatprep.mubr.bf16.mxu0 %v4516_v63  ;;  %2738 = vmatprep.mubr.bf16.mxu1 %v4516_v63  ;;  %v3562_v54 = vand.u32 %v3552_v50, %v4875_v11  ;;  %v3568_v57 = vand.u32 %v3554_v52, %v4875_v11  ;;  %v4466_v11 = vld [vmem:[%s5143_s2 + $0x80] sm:$0xff]   ;;  %v3782_v13 = vrot.slane %v3773_v4, %v3781_v9 }
 0x1f0   : > { %4184 = vmatmul.mubr.msk.bf16.gmra.mrb[4].mxu0 %vm2131_vm7, %v4457_v15  ;;  %4186 = vmatmul.mubr.msk.bf16.gmra.mrb[4].mxu1 %vm2131_vm7, %v4457_v15 }
 0x1f1   : > { %2861 = vmatprep.mubr.bf16.mxu0 %v4516_v63  ;;  %2914 = vmatprep.mubr.bf16.mxu1 %v4516_v63 }
 0x1f8   : > { %4193 = vmatmul.mubr.msk.bf16.vlgmr.msra.gmra.mrb[0].mxu0 %vm2131_vm7, %v4458_v20  ;;  %4195 = vmatmul.mubr.msk.bf16.vlgmr.msra.gmra.mrb[0].mxu1 %vm2131_vm7, %v4458_v20 }
 0x1f9   : > { %3016 = vmatpush1.bf16.msra.mxu0 %v3004_v23  ;;  %3069 = vmatpush1.bf16.msra.mxu1 %v3010_v24  ;;  %v5092_v24 = vrot.slane %v3782_v13, %v3777_v62 }
 0x1fa   : > { %3201 = vmatprep.subr.bf16.mxu0 %v3193_v25  ;;  %3254 = vmatprep.subr.bf16.mxu1 %v3199_v26  ;;  %v3702_v5 = vpop.permute.xlu1 %3701  ;;  %v3707_v14 = vpop.permute.xlu0 %3706  ;;  %v5095_v25 = vrot.slane %v4521_v61, %v3777_v62 }
 0x1fb   : > { %2871 = vmatprep.mubr.bf16.mxu0 %v4516_v63  ;;  %2924 = vmatprep.mubr.bf16.mxu1 %v4516_v63 }
 0x200   : > { %4194 = vmatmul.mubr.msk.bf16.gmra.mrb[4].mxu0 %vm2131_vm7, %v4459_v28  ;;  %4196 = vmatmul.mubr.msk.bf16.gmra.mrb[4].mxu1 %vm2131_vm7, %v4459_v28 }
 0x201   : > { %3047 = vmatprep.mubr.bf16.mxu0 %v4516_v63  ;;  %3100 = vmatprep.mubr.bf16.mxu1 %v4516_v63 }
 0x208   : > { %4203 = vmatmul.mubr.msk.bf16.vlgmr.msra.gmra.mrb[0].mxu0 %vm2131_vm7, %v4460_v33  ;;  %4205 = vmatmul.mubr.msk.bf16.vlgmr.msra.gmra.mrb[0].mxu1 %vm2131_vm7, %v4460_v33 }
 0x209   : > { %3202 = vmatpush1.bf16.msra.mxu0 %v3190_v34  ;;  %3255 = vmatpush1.bf16.msra.mxu1 %v3196_v35 }
 0x20a   : > { %3387 = vmatprep.subr.bf16.mxu0 %v3379_v36  ;;  %3440 = vmatprep.subr.bf16.mxu1 %v3385_v55 }
 0x20b   : > { %3057 = vmatprep.mubr.bf16.mxu0 %v4516_v63  ;;  %3110 = vmatprep.mubr.bf16.mxu1 %v4516_v63 }
 0x210   : > { %4204 = vmatmul.mubr.msk.bf16.gmra.mrb[4].mxu0 %vm2131_vm7, %v4461_v37  ;;  %4206 = vmatmul.mubr.msk.bf16.gmra.mrb[4].mxu1 %vm2131_vm7, %v4461_v37 }
 0x211   : > { %3233 = vmatprep.mubr.bf16.mxu0 %v4516_v63  ;;  %3286 = vmatprep.mubr.bf16.mxu1 %v4516_v63 }
 0x218   : > { %4213 = vmatmul.mubr.msk.bf16.vlgmr.msra.gmra.mrb[0].mxu0 %vm2131_vm7, %v4462_v40  ;;  %4215 = vmatmul.mubr.msk.bf16.vlgmr.msra.gmra.mrb[0].mxu1 %vm2131_vm7, %v4462_v40 }
 0x219   : > { %3388 = vmatpush1.bf16.msra.mxu0 %v3376_v43  ;;  %3441 = vmatpush1.bf16.msra.mxu1 %v3382_v44  ;;  %v3806_v43 = vld [vmem:[#allocation3 + $0x38] sm:$0xff] }
 0x21a   : > { %3573 = vmatprep.subr.bf16.mxu0 %v3565_v45  ;;  %3626 = vmatprep.subr.bf16.mxu1 %v3571_v47 }
 0x21b   : > { %3243 = vmatprep.mubr.bf16.mxu0 %v4516_v63  ;;  %3296 = vmatprep.mubr.bf16.mxu1 %v4516_v63 }
 0x220   : > { %4214 = vmatmul.mubr.msk.bf16.gmra.mrb[4].mxu0 %vm2131_vm7, %v4463_v48  ;;  %4216 = vmatmul.mubr.msk.bf16.gmra.mrb[4].mxu1 %vm2131_vm7, %v4463_v48 }
 0x221   : > { %3419 = vmatprep.mubr.bf16.mxu0 %v4516_v63  ;;  %3472 = vmatprep.mubr.bf16.mxu1 %v4516_v63 }
 0x228   : > { %4223 = vmatmul.mubr.msk.bf16.vlgmr.msra.gmra.mrb[0].mxu0 %vm2131_vm7, %v4464_v53  ;;  %4225 = vmatmul.mubr.msk.bf16.vlgmr.msra.gmra.mrb[0].mxu1 %vm2131_vm7, %v4464_v53 }
 0x229   : > { %3574 = vmatpush1.bf16.msra.mxu0 %v3562_v54  ;;  %3627 = vmatpush1.bf16.msra.mxu1 %v3568_v57 }
 0x22a   : > { %3429 = vmatprep.mubr.bf16.mxu0 %v4516_v63  ;;  %3482 = vmatprep.mubr.bf16.mxu1 %v4516_v63 }
 0x230   : > { %4224 = vmatmul.mubr.msk.bf16.gmra.mrb[4].mxu0 %vm2131_vm7, %v4465_v59  ;;  %4226 = vmatmul.mubr.msk.bf16.gmra.mrb[4].mxu1 %vm2131_vm7, %v4465_v59 }
 0x231   : > { %3605 = vmatprep.mubr.bf16.mxu0 %v4516_v63  ;;  %3658 = vmatprep.mubr.bf16.mxu1 %v4516_v63 }
 0x238   : > { %4233 = vmatmul.mubr.msk.bf16.vlgmr.msra.gmra.mrb[0].mxu0 %vm2131_vm7, %v4466_v11  ;;  %4235 = vmatmul.mubr.msk.bf16.vlgmr.msra.gmra.mrb[0].mxu1 %vm2131_vm7, %v4466_v11 }
 0x239   : > { %3615 = vmatprep.mubr.bf16.mxu0 %v4516_v63  ;;  %3668 = vmatprep.mubr.bf16.mxu1 %v4516_v63  ;;  %v3752_v63 = vand.u32 127, %v351_v0  ;;  %v3712_v0 = vpop.permute.xlu1 %3711 }
 0x23b   : > { %v3754_v6 = vadd.s32 256, %v3752_v63  ;;  %vm3760_vm0 = vcmp.ge.s32.totalorder %v3752_v63, 38 }
 0x23c   : > { %v3795_v10 = vsel %vm3760_vm0, %v3778_v7, 0.0 }
 0x23d   : > { %vm3767_vm10 = vcmp.lt.s32.totalorder %v3754_v6, 326  ;;  %v5088_v18 = vrot.slane %v3795_v10, %v3777_v62  ;;  %v3717_v44 = vpop.permute.xlu1 %3716 }
 0x23e   : > { %v3797_v12 = vsel %vm3767_vm10, %v3786_v8, 0.0 }
 0x23f   : > { %v5090_v20 = vrot.slane %v3797_v12, %v3777_v62 }
 0x240   : > { %4234 = vmatmul.mubr.msk.bf16.gmra.mrb[4].mxu0 %vm2131_vm7, %v4467_v60  ;;  %4236 = vmatmul.mubr.msk.bf16.gmra.mrb[4].mxu1 %vm2131_vm7, %v4467_v60 }
 0x241   : > { %4253 = vmatprep.mubr.msk.f32.mxu0 %vm4523_vm1, %v4521_v61  ;;  %v3928_v61 = vld [vmem:[%s5146_s5] sm:$0x3] }
 0x30b   : > { %v3607_v15 = vpop.f32.mrb[0].mxu0  ;;  %v3660_v16 = vpop.f32.mrb[0].mxu1 }
 0x30c   : > { %v3719_v17 = vadd.f32 %v3702_v5, %v3607_v15  ;;  %v3721_v19 = vadd.f32 %v3702_v5, %v3660_v16  ;;  %v3609_v21 = vpop.f32.mrb[1].mxu0  ;;  %v3662_v22 = vpop.f32.mrb[1].mxu1  ;;  %v3810_v16 = vld [vmem:[#allocation3 + $0x58] sm:$0xff] }
 0x30d   : > { %v3720_v23 = vadd.f32 %v3702_v5, %v3609_v21  ;;  %v3722_v3 = vadd.f32 %v3702_v5, %v3662_v22  ;;  %v3611_v26 = vpop.f32.mrb[2].mxu0  ;;  %v3664_v27 = vpop.f32.mrb[2].mxu1 }
 0x30e   : > { %v3735_v28 = vmax.f32 %v3719_v17, 0.0  ;;  %v3737_v29 = vmax.f32 %v3721_v19, 0.0  ;;  %v3723_v30 = vadd.f32 %v3707_v14, %v3611_v26  ;;  %v3725_v31 = vadd.f32 %v3707_v14, %v3664_v27  ;;  %v3613_v32 = vpop.f32.mrb[3].mxu0  ;;  %v3666_v33 = vpop.f32.mrb[3].mxu1  ;;  %v3814_v27 = vld [vmem:[#allocation3 + $0x78] sm:$0xff] }
 0x30f   : > { %v3736_v51 = vmax.f32 %v3720_v23, 0.0  ;;  %v3738_v58 = vmax.f32 %v3722_v3, 0.0  ;;  %v3724_v34 = vadd.f32 %v3707_v14, %v3613_v32  ;;  %v3726_v35 = vadd.f32 %v3707_v14, %v3666_v33 }
 0x310   : > { %v3831_v36 = vmul.f32 %v5088_v18, %v3735_v28  ;;  %v3833_v55 = vmul.f32 %v5090_v20, %v3737_v29  ;;  %v3739_v37 = vmax.f32 %v3723_v30, 0.0  ;;  %v3741_v46 = vmax.f32 %v3725_v31, 0.0 }
 0x311   : > { %v3832_v56 = vmul.f32 %v5092_v24, %v3736_v51  ;;  %v3834_v38 = vmul.f32 %v5095_v25, %v3738_v58  ;;  %v3740_v39 = vmax.f32 %v3724_v34, 0.0  ;;  %v3742_v40 = vmax.f32 %v3726_v35, 0.0 }
 0x312   : > { %v3835_v41 = vmul.f32 %v5088_v18, %v3739_v37  ;;  %v3837_v42 = vmul.f32 %v5090_v20, %v3741_v46 }
 0x313   : > { %v3850_v45 = vadd.f32 %v3834_v38, %v3802_v1  ;;  %v3836_v47 = vmul.f32 %v5092_v24, %v3740_v39  ;;  %v3838_v48 = vmul.f32 %v5095_v25, %v3742_v40  ;;  %v3617_v49 = vpop.f32.mrb[4].mxu0  ;;  %v3670_v50 = vpop.f32.mrb[4].mxu1  ;;  %v3899_v32 = vadd.f32 %v3832_v56, %v3831_v36 }
 0x314   : > { %v3727_v52 = vadd.f32 %v3712_v0, %v3617_v49  ;;  %v3729_v53 = vadd.f32 %v3712_v0, %v3670_v50  ;;  %v3619_v54 = vpop.f32.mrb[5].mxu0  ;;  %v3672_v57 = vpop.f32.mrb[5].mxu1 }
 0x315   : > { %3867 = vst.msk [vmem:[#allocation3 + $0x18] sm:$0xff] %vm292_vm15, %v3850_v45  ;;  %v3854_v59 = vadd.f32 %v3838_v48, %v3806_v43  ;;  %v3728_v11 = vadd.f32 %v3712_v0, %v3619_v54  ;;  %v3730_v60 = vadd.f32 %v3712_v0, %v3672_v57  ;;  %v3621_v63 = vpop.f32.mrb[6].mxu0  ;;  %v3674_v62 = vpop.f32.mrb[6].mxu1  ;;  %v3905_v33 = vadd.f32 %v3836_v47, %v3835_v41  ;;  %v3927_v57 = vld [vmem:[%s5145_s4] sm:$0x3] }
 0x316   : > { %v3743_v2 = vmax.f32 %v3727_v52, 0.0  ;;  %v3745_v4 = vmax.f32 %v3729_v53, 0.0  ;;  %v3731_v6 = vadd.f32 %v3717_v44, %v3621_v63  ;;  %v3733_v5 = vadd.f32 %v3717_v44, %v3674_v62  ;;  %v3623_v7 = vpop.f32.mrb[7].mxu0  ;;  %v3676_v8 = vpop.f32.mrb[7].mxu1 }
 0x317   : > { %3871 = vst.msk [vmem:[#allocation3 + $0x38] sm:$0xff] %vm292_vm15, %v3854_v59  ;;  %v3744_v9 = vmax.f32 %v3728_v11, 0.0  ;;  %v3746_v10 = vmax.f32 %v3730_v60, 0.0  ;;  %v3732_v12 = vadd.f32 %v3717_v44, %v3623_v7  ;;  %v3734_v13 = vadd.f32 %v3717_v44, %v3676_v8 }
 0x318   : > { %v3839_v14 = vmul.f32 %v5088_v18, %v3743_v2  ;;  %v3841_v15 = vmul.f32 %v5090_v20, %v3745_v4  ;;  %v3747_v0 = vmax.f32 %v3731_v6, 0.0  ;;  %v3749_v17 = vmax.f32 %v3733_v5, 0.0 }
 0x319   : > { %v3840_v19 = vmul.f32 %v5092_v24, %v3744_v9  ;;  %v3842_v21 = vmul.f32 %v5095_v25, %v3746_v10  ;;  %v3748_v22 = vmax.f32 %v3732_v12, 0.0  ;;  %v3750_v23 = vmax.f32 %v3734_v13, 0.0 }
 0x31a   : > { %v3843_v3 = vmul.f32 %v5088_v18, %v3747_v0  ;;  %v3845_v26 = vmul.f32 %v5090_v20, %v3749_v17  ;;  %v3900_v35 = vadd.f32 %v3899_v32, %v3833_v55  ;;  %v3906_v18 = vadd.f32 %v3905_v33, %v3837_v42 }
 0x31b   : > { %v3858_v28 = vadd.f32 %v3842_v21, %v3810_v16  ;;  %v3844_v29 = vmul.f32 %v5092_v24, %v3748_v22  ;;  %v3846_v30 = vmul.f32 %v5095_v25, %v3750_v23  ;;  %v3911_v34 = vadd.f32 %v3840_v19, %v3839_v14 }
 0x31c   : > { %v3886_v31 = vld [vmem:[#allocation3 + $0x18] sm:$0xff]  ;;  %v4522_v42 = vmov 0.0|0.0  }
 0x31d   : > { %3875 = vst.msk [vmem:[#allocation3 + $0x58] sm:$0xff] %vm292_vm15, %v3858_v28  ;;  %v3862_v51 = vadd.f32 %v3846_v30, %v3814_v27  ;;  %v3901_v58 = vsel %vm292_vm15, %v3886_v31, 0.0  ;;  %v3912_v37 = vadd.f32 %v3911_v34, %v3841_v15  ;;  %v3917_v24 = vadd.f32 %v3844_v29, %v3843_v3  ;;  %4256 = vmatprep.subr.bf16.mxu0 %v4522_v42 }
 0x31e   : > { %v3890_v1 = vld [vmem:[#allocation3 + $0x38] sm:$0xff]  ;;  %v3902_v46 = vadd.f32 %v3901_v58, %v3900_v35 }
 0x31f   : > { %3879 = vst.msk [vmem:[#allocation3 + $0x78] sm:$0xff] %vm292_vm15, %v3862_v51  ;;  %v3907_v20 = vsel %vm292_vm15, %v3890_v1, 0.0  ;;  %v3918_v38 = vadd.f32 %v3917_v24, %v3845_v26 }
 0x320   : > { %v3908_v25 = vadd.f32 %v3907_v20, %v3906_v18  ;;  %3903 = vadd.xlane.f32.xlu0 %v3902_v46 }
 0x322   : > { %3909 = vadd.xlane.f32.xlu1 %v3908_v25 }
 0x324   : > { %v3894_v36 = vld [vmem:[#allocation3 + $0x58] sm:$0xff] }
 0x325   : > { %v3913_v56 = vsel %vm292_vm15, %v3894_v36, 0.0 }
 0x326   : > { %v3914_v39 = vadd.f32 %v3913_v56, %v3912_v37  ;;  %v3898_v40 = vld [vmem:[#allocation3 + $0x78] sm:$0xff] }
 0x327   : > { %v3919_v55 = vsel %vm292_vm15, %v3898_v40, 0.0 }
 0x328   : > { %3915 = vadd.xlane.f32.xlu0 %v3914_v39  ;;  %v3920_v41 = vadd.f32 %v3919_v55, %v3918_v38 }
 0x32c   : > { %3921 = vadd.xlane.f32.xlu0 %v3920_v41 }
 0x3ad   : > { %v3904_v43 = vpop.xlane.xlu0 %3903 }
 0x3ae   : > { %v3923_v45 = vmul.f32 0.00390625, %v3904_v43 }
 0x3af   : > { %v3910_v44 = vpop.xlane.xlu1 %3909 }
 0x3b0   : > { %v3924_v47 = vmul.f32 0.00390625, %v3910_v44 }
 0x3b2   : > { %v4257_v48 = vpack.c.bf16 %v3924_v47, %v3923_v45 }
 0x3b4   : > { %4258 = vmatpush3.bf16.msra.mxu0 %v4257_v48 }
 0x3b5   : > { %v3916_v49 = vpop.xlane.xlu0 %3915  ;;  %4259 = vmatprep.subr.bf16.mxu0 %v4522_v42 }
 0x3b6   : > { %v3925_v52 = vmul.f32 0.00390625, %v3916_v49 }
 0x3b9   : > { %v3922_v50 = vpop.xlane.xlu0 %3921 }
 0x3ba   : > { %v3926_v53 = vmul.f32 0.00390625, %v3922_v50 }
 0x3bc   : > { %v4260_v54 = vpack.c.bf16 %v3926_v53, %v3925_v52 }
 0x3be   : > { %4261 = vmatpush3.bf16.msra.mxu0 %v4260_v54 }
 0x3c1   : > { %4254 = vmatmul.mubr.msk.f32.vlgmr.msra.gmra.mrb[8].mxu0 %vm3929_vm3, %v3927_v57 }
 0x494   : > { %v3999_v59 = vpop.f32.mrb[8].mxu0 }
 0x495   : > { %v4000_v11 = vadd.f32 %v3999_v59, %v3928_v61  ;;  %v4255_v60 = vpop.f32.mrb[9].mxu0 }
 0x497   : > { %4004 = vst.msk [vmem:[%s277_s28] sm:$0x3] %vm4003_vm4, %v4000_v11 }
 0x498 PF: > { %s16_s23 = sadd.s32 1, %s4490_s23   ;;  %s5150_s21 = smov %s4486_s22 }
 0x499   : > { %p13_p5 = scmp.ge.s32.totalorder %s16_s23, 4   ;;  %s5151_s22 = smov %s5153_s24 }
 0x49b   :  { %15 = sbr.rel (!%p13_p5) target bundleno = 2 (0x2), region = 94 }

</bundles_post_ra>
